<compile_context>
chip_gen: v7x
topology: tpu7x:2x2x1
jax: 0.10.0
libtpu: 0.0.40
codegen_flags: <defaults>
</compile_context>

<pallas_src>
import jax
import jax.numpy as jnp
from jax import lax
from jax.experimental import pallas as pl
from jax.experimental.pallas import tpu as pltpu


def _round_up(x, m):
    return (x + m - 1) // m * m


def _pad_axis(a, axis, new_size, value=0.0):
    pad = new_size - a.shape[axis]
    if pad <= 0:
        return a
    widths = [(0, 0)] * a.ndim
    widths[axis] = (0, pad)
    return jnp.pad(a, widths, constant_values=value)


def _pad_gates(w, hp, axis):
    """Pad each of the 3 gate blocks [r|z|n] along `axis` from H to Hp (zeros)."""
    parts = jnp.split(w, 3, axis=axis)
    return jnp.concatenate([_pad_axis(p, axis, hp) for p in parts], axis=axis)


def _make_decoder_kernel(num_layers, Hp, Tc, T, num_chunks, compute_dtype):
    def kernel(*refs):
        emb_ref = refs[0]                              # (Tc, E)   f32, current chunk
        h0_ref = refs[1]                               # (L, Hp)   f32, initial hidden
        layer_refs = refs[2:2 + 4 * num_layers]        # per layer: w_ih, w_hh, b_comb, b_hh_n
        wout_ref = refs[2 + 4 * num_layers]            # (Hp, Wp)  compute_dtype
        bout_ref = refs[3 + 4 * num_layers]            # (1, Wp)   f32 (-1e30 in padded cols)
        outs_ref = refs[4 + 4 * num_layers]            # (Tc, Wp)  f32 log-probs for chunk
        hout_ref = refs[5 + 4 * num_layers]            # (L, Hp)   f32 final hidden
        gi0_scr = refs[6 + 4 * num_layers]             # (Tc, 3Hp) f32 layer-0 input gates
        hs_scr = refs[7 + 4 * num_layers]              # (Tc, Hp)  f32 top-layer hidden states
        hcarry = refs[8 + 4 * num_layers]              # (L, Hp)   f32 hidden carried over chunks

        c = pl.program_id(0)

        @pl.when(c == 0)
        def _init():
            hcarry[...] = h0_ref[...]

        # ---- chunk prologue (off the serial recurrence path) -------------------------
        # Layer-0 input gates for every timestep of the chunk in one batched matmul.
        gi0_scr[...] = (
            jnp.dot(emb_ref[...].astype(compute_dtype), layer_refs[0][...],
                    preferred_element_type=jnp.float32)
            + layer_refs[2][...]
        )
        # Keep rows beyond `valid` finite for the batched projection below.
        hs_scr[...] = jnp.zeros_like(hs_scr)

        # Number of real (non-padded) timesteps in this chunk (T, Tc, num_chunks static).
        valid = jnp.where(c == num_chunks - 1, T - (num_chunks - 1) * Tc, Tc)

        h_init = tuple(hcarry[pl.ds(l, 1), :] for l in range(num_layers))

        # ---- serial GRU recurrence over timesteps of this chunk ----------------------
        def step(t, carry):
            hs = list(carry)
            gi = gi0_scr[pl.ds(t, 1), :]               # (1, 3Hp) precomputed layer-0 gates
            x = None
            for l in range(num_layers):
                w_ih = layer_refs[4 * l + 0]
                w_hh = layer_refs[4 * l + 1]
                b_comb = layer_refs[4 * l + 2]
                b_hh_n = layer_refs[4 * l + 3]
                if l > 0:
                    gi = jnp.dot(x.astype(compute_dtype), w_ih[...],
                                 preferred_element_type=jnp.float32) + b_comb[...]
                h_prev = hs[l]
                gh = jnp.dot(h_prev.astype(compute_dtype), w_hh[...],
                             preferred_element_type=jnp.float32)
                # PyTorch GRU gate math (r/z biases pre-summed into gi; b_hn kept separate).
                r = jax.nn.sigmoid(gi[:, 0:Hp] + gh[:, 0:Hp])
                z = jax.nn.sigmoid(gi[:, Hp:2 * Hp] + gh[:, Hp:2 * Hp])
                n = jnp.tanh(gi[:, 2 * Hp:3 * Hp] + r * (gh[:, 2 * Hp:3 * Hp] + b_hh_n[...]))
                h_new = (1.0 - z) * n + z * h_prev
                hs[l] = h_new
                x = h_new
            hs_scr[pl.ds(t, 1), :] = x                 # top-layer hidden for this timestep
            return tuple(hs)

        h_fin = lax.fori_loop(0, valid, step, h_init)

        for l in range(num_layers):
            hcarry[pl.ds(l, 1), :] = h_fin[l]
        hout_ref[...] = hcarry[...]                    # written every chunk (robust)

        # ---- chunk epilogue: batched projection + log_softmax ------------------------
        logits = (jnp.dot(hs_scr[...].astype(compute_dtype), wout_ref[...],
                          preferred_element_type=jnp.float32) + bout_ref[...])
        m = jnp.max(logits, axis=1, keepdims=True)
        shifted = logits - m
        lse = jnp.log(jnp.sum(jnp.exp(shifted), axis=1, keepdims=True))
        outs_ref[...] = shifted - lse

    return kernel


def decoder_forward(tokens, h_state, params, *, time_chunk=128,
                    compute_dtype=jnp.bfloat16):
    """tokens: int array (any shape), h_state: (L, 1, H) float32.

    Returns (outs, h_state_new) with outs: (T, wordsize) log-probabilities,
    matching PyTorch Decoder.forward semantics (batch forced to 1 by the .view).
    """
    emb_table = params["embedding"]                    # (wordsize, E)
    flat = tokens.reshape(-1).astype(jnp.int32)
    emb = jnp.take(emb_table, flat, axis=0)            # (T, E)  glue: embedding gather
    T, E = emb.shape
    L, _, H = h_state.shape
    W = params["w_out"].shape[1]

    Hp = _round_up(H, 128)                             # lane-dense hidden width
    Wp = _round_up(W, 128)                             # lane-dense vocab width
    Tc = min(time_chunk, _round_up(T, 8))              # timesteps per chunk (sublane aligned)
    T_pad = _round_up(T, Tc)
    num_chunks = T_pad // Tc

    emb_p = _pad_axis(emb, 0, T_pad)                   # (T_pad, E)
    h0_p = _pad_axis(h_state.reshape(L, H).astype(jnp.float32), 1, Hp)   # (L, Hp)

    in_arrays = [emb_p, h0_p]
    in_specs = [
        pl.BlockSpec((Tc, E), lambda c: (c, 0)),
        pl.BlockSpec((L, Hp), lambda c: (0, 0)),
    ]

    # Constant-index weight/bias inputs are only DMA'd once for the whole grid.
    for layer in range(L):
        w_ih = params[f"w_ih_{layer}"]                 # (in, 3H)
        w_hh = params[f"w_hh_{layer}"]                 # (H, 3H)
        b_ih = params[f"b_ih_{layer}"]                 # (3H,)
        b_hh = params[f"b_hh_{layer}"]                 # (3H,)

        # Pre-sum the r/z biases (b_ih + b_hh); keep the n-gate hh bias separate.
        b_comb = jnp.concatenate([b_ih[:2 * H] + b_hh[:2 * H], b_ih[2 * H:]])

        w_ih_p = _pad_gates(w_ih, Hp, axis=1)          # pad each gate's columns H -> Hp
        if layer > 0:
            w_ih_p = _pad_axis(w_ih_p, 0, Hp)          # pad input rows (hidden of prev layer)
        w_hh_p = _pad_axis(_pad_gates(w_hh, Hp, axis=1), 0, Hp)
        b_comb_p = _pad_gates(b_comb.reshape(1, 3 * H), Hp, axis=1)        # (1, 3Hp)
        b_hh_n_p = _pad_axis(b_hh[2 * H:].reshape(1, H), 1, Hp)            # (1, Hp)

        arrs = [
            w_ih_p.astype(compute_dtype),
            w_hh_p.astype(compute_dtype),
            b_comb_p.astype(jnp.float32),
            b_hh_n_p.astype(jnp.float32),
        ]
        for arr in arrs:
            in_arrays.append(arr)
            in_specs.append(pl.BlockSpec(arr.shape, lambda c: (0, 0)))

    # TODO(synk): for production vocab sizes, tile the vocab (Wp) dimension of the output
    # projection (second grid axis or separate pallas_call) to respect v7x's 64 MiB VMEM.
    w_out_p = _pad_axis(_pad_axis(params["w_out"], 1, Wp), 0, Hp).astype(compute_dtype)
    b_out_p = _pad_axis(params["b_out"].reshape(1, W), 1, Wp,
                        value=-1e30).astype(jnp.float32)
    in_arrays += [w_out_p, b_out_p]
    in_specs += [
        pl.BlockSpec(w_out_p.shape, lambda c: (0, 0)),
        pl.BlockSpec(b_out_p.shape, lambda c: (0, 0)),
    ]

    kernel = _make_decoder_kernel(L, Hp, Tc, T, num_chunks, compute_dtype)

    outs_p, h_new_p = pl.pallas_call(
        kernel,
        out_shape=(
            jax.ShapeDtypeStruct((T_pad, Wp), jnp.float32),
            jax.ShapeDtypeStruct((L, Hp), jnp.float32),
        ),
        grid=(num_chunks,),
        in_specs=in_specs,
        out_specs=(
            pl.BlockSpec((Tc, Wp), lambda c: (c, 0)),
            pl.BlockSpec((L, Hp), lambda c: (0, 0)),
        ),
        scratch_shapes=[
            pltpu.VMEM((Tc, 3 * Hp), jnp.float32),     # layer-0 input gates for the chunk
            pltpu.VMEM((Tc, Hp), jnp.float32),         # top-layer hidden states for the chunk
            pltpu.VMEM((L, Hp), jnp.float32),          # hidden-state carry across chunks
        ],
        compiler_params=pltpu.CompilerParams(dimension_semantics=("arbitrary",)),
    )(*in_arrays)

    outs = outs_p[:T, :W]
    h_new = h_new_p[:, :H].reshape(L, 1, H)
    return outs, h_new


def decoder_reference(tokens, h_state, params):
    """Pure-JAX float32 reference mirroring PyTorch Decoder.forward."""
    hi = jax.lax.Precision.HIGHEST
    emb = jnp.take(params["embedding"], tokens.reshape(-1), axis=0)
    T, _ = emb.shape
    L, _, H = h_state.shape
    h = [h_state[l] for l in range(L)]                 # each (1, H)
    tops = []
    for t in range(T):
        x = emb[t:t + 1]
        for l in range(L):
            gi = jnp.dot(x, params[f"w_ih_{l}"], precision=hi) + params[f"b_ih_{l}"]
            gh = jnp.dot(h[l], params[f"w_hh_{l}"], precision=hi) + params[f"b_hh_{l}"]
            r = jax.nn.sigmoid(gi[:, :H] + gh[:, :H])
            z = jax.nn.sigmoid(gi[:, H:2 * H] + gh[:, H:2 * H])
            n = jnp.tanh(gi[:, 2 * H:] + r * gh[:, 2 * H:])
            h[l] = (1.0 - z) * n + z * h[l]
            x = h[l]
        tops.append(x)
    hs = jnp.concatenate(tops, axis=0)
    logits = jnp.dot(hs, params["w_out"], precision=hi) + params["b_out"]
    return jax.nn.log_softmax(logits, axis=1), jnp.stack(h, axis=0)


def init_params(key, wordsize, embaddingsize, hiddensize, numlayers):
    keys = jax.random.split(key, 4 + 4 * numlayers)
    params = {}
    params["embedding"] = jax.random.normal(keys[0], (wordsize, embaddingsize), jnp.float32)
    bound = 1.0 / float(hiddensize) ** 0.5
    idx = 1
    for layer in range(numlayers):
        in_size = embaddingsize if layer == 0 else hiddensize
        params[f"w_ih_{layer}"] = jax.random.uniform(
            keys[idx], (in_size, 3 * hiddensize), jnp.float32, -bound, bound); idx += 1
        params[f"w_hh_{layer}"] = jax.random.uniform(
            keys[idx], (hiddensize, 3 * hiddensize), jnp.float32, -bound, bound); idx += 1
        params[f"b_ih_{layer}"] = jax.random.uniform(
            keys[idx], (3 * hiddensize,), jnp.float32, -bound, bound); idx += 1
        params[f"b_hh_{layer}"] = jax.random.uniform(
            keys[idx], (3 * hiddensize,), jnp.float32, -bound, bound); idx += 1
    params["w_out"] = jax.random.uniform(
        keys[idx], (hiddensize, wordsize), jnp.float32, -bound, bound); idx += 1
    params["b_out"] = jax.random.uniform(
        keys[idx], (wordsize,), jnp.float32, -bound, bound)
    return params


if __name__ == "__main__":
    wordsize, embaddingsize, hiddensize, numlayers = 64, 32, 32, 2
    seq_len = 8

    root = jax.random.PRNGKey(0)
    k_params, k_tokens = jax.random.split(root)
    params = init_params(k_params, wordsize, embaddingsize, hiddensize, numlayers)

    tokens = jax.random.randint(k_tokens, (seq_len,), 0, wordsize, dtype=jnp.int32)
    h0 = jnp.zeros((numlayers, 1, hiddensize), jnp.float32)

    outs_ref, h_ref = decoder_reference(tokens, h0, params)

    # f32 kernel path: tight structural/numerical check against the reference.
    outs_f32, h_f32 = decoder_forward(tokens, h0, params, compute_dtype=jnp.float32)
    # bf16-matmul kernel path (optimized default for v6e/v7x): looser tolerance.
    outs_bf, h_bf = decoder_forward(tokens, h0, params)
    jax.block_until_ready((outs_f32, h_f32, outs_bf, h_bf))

    assert outs_f32.shape == (seq_len, wordsize)
    assert h_f32.shape == (numlayers, 1, hiddensize)
    assert outs_bf.shape == (seq_len, wordsize)
    assert h_bf.shape == (numlayers, 1, hiddensize)

    assert float(jnp.max(jnp.abs(outs_f32 - outs_ref))) < 2e-2
    assert float(jnp.max(jnp.abs(h_f32 - h_ref))) < 2e-2
    assert float(jnp.max(jnp.abs(outs_bf - outs_ref))) < 2.5e-1
    assert float(jnp.max(jnp.abs(h_bf - h_ref))) < 2.5e-1
    # log_softmax rows should sum (in prob space) to ~1
    assert bool(jnp.all(jnp.abs(jnp.sum(jnp.exp(outs_bf), axis=1) - 1.0) < 1e-3))

    print("KERNEL_OK")
</pallas_src>

<mosaic_0001>
module attributes {stable_mosaic.version = 11 : i64} {
  func.func @kernel(%arg0: i32, %arg1: memref<8x32xf32, #tpu.memory_space<vmem>>, %arg2: memref<2x128xf32, #tpu.memory_space<vmem>>, %arg3: memref<32x384xf32, #tpu.memory_space<vmem>>, %arg4: memref<128x384xf32, #tpu.memory_space<vmem>>, %arg5: memref<1x384xf32, #tpu.memory_space<vmem>>, %arg6: memref<1x128xf32, #tpu.memory_space<vmem>>, %arg7: memref<128x384xf32, #tpu.memory_space<vmem>>, %arg8: memref<128x384xf32, #tpu.memory_space<vmem>>, %arg9: memref<1x384xf32, #tpu.memory_space<vmem>>, %arg10: memref<1x128xf32, #tpu.memory_space<vmem>>, %arg11: memref<128x128xf32, #tpu.memory_space<vmem>>, %arg12: memref<1x128xf32, #tpu.memory_space<vmem>>, %arg13: memref<8x128xf32, #tpu.memory_space<vmem>>, %arg14: memref<2x128xf32, #tpu.memory_space<vmem>>, %arg15: memref<8x384xf32, #tpu.memory_space<vmem>>, %arg16: memref<8x128xf32, #tpu.memory_space<vmem>>, %arg17: memref<2x128xf32, #tpu.memory_space<vmem>>) attributes {dimension_semantics = [#tpu.dimension_semantics<arbitrary>], iteration_bounds = array<i64: 1>, scalar_prefetch = 0 : i64, scratch_operands = 3 : i64, tpu.core_type = #tpu.core_type<tc>, window_params = [{transform_indices = @transform_0, window_bounds = array<i64: 8, 32>}, {pipeline_mode = #tpu.pipeline_mode<synchronous>, transform_indices = @transform_1, window_bounds = array<i64: 2, 128>}, {pipeline_mode = #tpu.pipeline_mode<synchronous>, transform_indices = @transform_2, window_bounds = array<i64: 32, 384>}, {pipeline_mode = #tpu.pipeline_mode<synchronous>, transform_indices = @transform_3, window_bounds = array<i64: 128, 384>}, {pipeline_mode = #tpu.pipeline_mode<synchronous>, transform_indices = @transform_4, window_bounds = array<i64: 1, 384>}, {pipeline_mode = #tpu.pipeline_mode<synchronous>, transform_indices = @transform_5, window_bounds = array<i64: 1, 128>}, {pipeline_mode = #tpu.pipeline_mode<synchronous>, transform_indices = @transform_6, window_bounds = array<i64: 128, 384>}, {pipeline_mode = #tpu.pipeline_mode<synchronous>, transform_indices = @transform_7, window_bounds = array<i64: 128, 384>}, {pipeline_mode = #tpu.pipeline_mode<synchronous>, transform_indices = @transform_8, window_bounds = array<i64: 1, 384>}, {pipeline_mode = #tpu.pipeline_mode<synchronous>, transform_indices = @transform_9, window_bounds = array<i64: 1, 128>}, {pipeline_mode = #tpu.pipeline_mode<synchronous>, transform_indices = @transform_10, window_bounds = array<i64: 128, 128>}, {pipeline_mode = #tpu.pipeline_mode<synchronous>, transform_indices = @transform_11, window_bounds = array<i64: 1, 128>}, {transform_indices = @transform_12, window_bounds = array<i64: 8, 128>}, {pipeline_mode = #tpu.pipeline_mode<synchronous>, transform_indices = @transform_13, window_bounds = array<i64: 2, 128>}]} {
    %c0_i32 = arith.constant 0 : i32
    %0 = arith.cmpi eq, %arg0, %c0_i32 : i32
    %1 = arith.extui %0 : i1 to i32
    %c0_i32_0 = arith.constant 0 : i32
    %2 = arith.cmpi ne, %1, %c0_i32_0 : i32
    scf.if %2 {
      %c0_36 = arith.constant 0 : index
      %c0_37 = arith.constant 0 : index
      %40 = vector.load %arg2[%c0_36, %c0_37] : memref<2x128xf32, #tpu.memory_space<vmem>>, vector<2x128xf32>
      %c0_38 = arith.constant 0 : index
      %c0_39 = arith.constant 0 : index
      %41 = vector.load %arg17[%c0_38, %c0_39] : memref<2x128xf32, #tpu.memory_space<vmem>>, vector<2x128xf32>
      tpu.vector_store %arg17[%c0_38, %c0_39], %40 {strides = array<i32>} : memref<2x128xf32, #tpu.memory_space<vmem>>, vector<2x128xf32>,
    } else {
    }
    %c0 = arith.constant 0 : index
    %c0_1 = arith.constant 0 : index
    %3 = vector.load %arg1[%c0, %c0_1] : memref<8x32xf32, #tpu.memory_space<vmem>>, vector<8x32xf32>
    %c0_2 = arith.constant 0 : index
    %c0_3 = arith.constant 0 : index
    %4 = vector.load %arg3[%c0_2, %c0_3] : memref<32x384xf32, #tpu.memory_space<vmem>>, vector<32x384xf32>
    %cst = arith.constant dense<0.000000e+00> : vector<8x384xf32>
    %5 = tpu.matmul %3, %4, %cst {dimension_numbers = #tpu.dot_dimension_numbers<[1], [0], [0], [1], [0, 0, 1, 1], [], []>} : vector<8x32xf32>, vector<32x384xf32>, vector<8x384xf32> -> vector<8x384xf32>
    %c0_4 = arith.constant 0 : index
    %c0_5 = arith.constant 0 : index
    %6 = vector.load %arg5[%c0_4, %c0_5] : memref<1x384xf32, #tpu.memory_space<vmem>>, vector<1x384xf32>
    %7 = vector.broadcast %6 : vector<1x384xf32> to vector<8x384xf32>
    %8 = arith.addf %5, %7 : vector<8x384xf32>
    %c0_6 = arith.constant 0 : index
    %c0_7 = arith.constant 0 : index
    %9 = vector.load %arg15[%c0_6, %c0_7] : memref<8x384xf32, #tpu.memory_space<vmem>>, vector<8x384xf32>
    tpu.vector_store %arg15[%c0_6, %c0_7], %8 {strides = array<i32>} : memref<8x384xf32, #tpu.memory_space<vmem>>, vector<8x384xf32>,
    %cst_8 = arith.constant 0.000000e+00 : f32
    %10 = vector.broadcast %cst_8 : f32 to vector<8x128xf32>
    %c0_9 = arith.constant 0 : index
    %c0_10 = arith.constant 0 : index
    %11 = vector.load %arg16[%c0_9, %c0_10] : memref<8x128xf32, #tpu.memory_space<vmem>>, vector<8x128xf32>
    tpu.vector_store %arg16[%c0_9, %c0_10], %10 {strides = array<i32>} : memref<8x128xf32, #tpu.memory_space<vmem>>, vector<8x128xf32>,
    %c0_i32_11 = arith.constant 0 : i32
    %12 = arith.cmpi eq, %arg0, %c0_i32_11 : i32
    %c8_i32 = arith.constant 8 : i32
    %c8_i32_12 = arith.constant 8 : i32
    %13 = arith.select %12, %c8_i32, %c8_i32_12 : i32
    %c0_13 = arith.constant 0 : index
    %c0_14 = arith.constant 0 : index
    %14 = vector.load %arg17[%c0_13, %c0_14] : memref<2x128xf32, #tpu.memory_space<vmem>>, vector<1x128xf32>
    %c1 = arith.constant 1 : index
    %c0_15 = arith.constant 0 : index
    %15 = vector.load %arg17[%c1, %c0_15] : memref<2x128xf32, #tpu.memory_space<vmem>>, vector<1x128xf32>
    %c0_i32_16 = arith.constant 0 : i32
    %16 = arith.subi %13, %c0_i32_16 : i32
    %17 = arith.addi %c0_i32_16, %16 : i32
    %c1_i32 = arith.constant 1 : i32
    %18:2 = scf.for %arg18 = %c0_i32_16 to %17 step %c1_i32 iter_args(%arg19 = %14, %arg20 = %15) -> (vector<1x128xf32>, vector<1x128xf32>)  : i32 {
      %40 = arith.index_cast %arg18 : i32 to index
      %c0_36 = arith.constant 0 : index
      %41 = vector.load %arg15[%40, %c0_36] : memref<8x384xf32, #tpu.memory_space<vmem>>, vector<1x384xf32>
      %c0_37 = arith.constant 0 : index
      %c0_38 = arith.constant 0 : index
      %42 = vector.load %arg4[%c0_37, %c0_38] : memref<128x384xf32, #tpu.memory_space<vmem>>, vector<128x384xf32>
      %cst_39 = arith.constant dense<0.000000e+00> : vector<1x384xf32>
      %43 = tpu.matmul %arg19, %42, %cst_39 {dimension_numbers = #tpu.dot_dimension_numbers<[1], [0], [0], [1], [0, 0, 1, 1], [], []>} : vector<1x128xf32>, vector<128x384xf32>, vector<1x384xf32> -> vector<1x384xf32>
      %44 = vector.extract_strided_slice %41 {offsets = [0, 0], sizes = [1, 128], strides = [1, 1]} : vector<1x384xf32> to vector<1x128xf32>
      %45 = vector.extract_strided_slice %43 {offsets = [0, 0], sizes = [1, 128], strides = [1, 1]} : vector<1x384xf32> to vector<1x128xf32>
      %46 = arith.addf %44, %45 : vector<1x128xf32>
      %47 = arith.negf %46 : vector<1x128xf32>
      %48 = math.exp %47 : vector<1x128xf32>
      %cst_40 = arith.constant 1.000000e+00 : f32
      %49 = vector.broadcast %cst_40 : f32 to vector<1x128xf32>
      %50 = arith.addf %49, %48 : vector<1x128xf32>
      %51 = arith.divf %49, %50 : vector<1x128xf32>
      %52 = vector.extract_strided_slice %41 {offsets = [0, 128], sizes = [1, 128], strides = [1, 1]} : vector<1x384xf32> to vector<1x128xf32>
      %53 = vector.extract_strided_slice %43 {offsets = [0, 128], sizes = [1, 128], strides = [1, 1]} : vector<1x384xf32> to vector<1x128xf32>
      %54 = arith.addf %52, %53 : vector<1x128xf32>
      %55 = arith.negf %54 : vector<1x128xf32>
      %56 = math.exp %55 : vector<1x128xf32>
      %cst_41 = arith.constant 1.000000e+00 : f32
      %57 = vector.broadcast %cst_41 : f32 to vector<1x128xf32>
      %58 = arith.addf %57, %56 : vector<1x128xf32>
      %59 = arith.divf %57, %58 : vector<1x128xf32>
      %60 = vector.extract_strided_slice %41 {offsets = [0, 256], sizes = [1, 128], strides = [1, 1]} : vector<1x384xf32> to vector<1x128xf32>
      %61 = vector.extract_strided_slice %43 {offsets = [0, 256], sizes = [1, 128], strides = [1, 1]} : vector<1x384xf32> to vector<1x128xf32>
      %c0_42 = arith.constant 0 : index
      %c0_43 = arith.constant 0 : index
      %62 = vector.load %arg6[%c0_42, %c0_43] : memref<1x128xf32, #tpu.memory_space<vmem>>, vector<1x128xf32>
      %63 = arith.addf %61, %62 : vector<1x128xf32>
      %64 = arith.mulf %51, %63 : vector<1x128xf32>
      %65 = arith.addf %60, %64 : vector<1x128xf32>
      %66 = math.tanh %65 : vector<1x128xf32>
      %cst_44 = arith.constant 1.000000e+00 : f32
      %67 = vector.broadcast %cst_44 : f32 to vector<1x128xf32>
      %68 = arith.subf %67, %59 : vector<1x128xf32>
      %69 = arith.mulf %68, %66 : vector<1x128xf32>
      %70 = arith.mulf %59, %arg19 : vector<1x128xf32>
      %71 = arith.addf %69, %70 : vector<1x128xf32>
      %c0_45 = arith.constant 0 : index
      %c0_46 = arith.constant 0 : index
      %72 = vector.load %arg7[%c0_45, %c0_46] : memref<128x384xf32, #tpu.memory_space<vmem>>, vector<128x384xf32>
      %cst_47 = arith.constant dense<0.000000e+00> : vector<1x384xf32>
      %73 = tpu.matmul %71, %72, %cst_47 {dimension_numbers = #tpu.dot_dimension_numbers<[1], [0], [0], [1], [0, 0, 1, 1], [], []>} : vector<1x128xf32>, vector<128x384xf32>, vector<1x384xf32> -> vector<1x384xf32>
      %c0_48 = arith.constant 0 : index
      %c0_49 = arith.constant 0 : index
      %74 = vector.load %arg9[%c0_48, %c0_49] : memref<1x384xf32, #tpu.memory_space<vmem>>, vector<1x384xf32>
      %75 = arith.addf %73, %74 : vector<1x384xf32>
      %c0_50 = arith.constant 0 : index
      %c0_51 = arith.constant 0 : index
      %76 = vector.load %arg8[%c0_50, %c0_51] : memref<128x384xf32, #tpu.memory_space<vmem>>, vector<128x384xf32>
      %cst_52 = arith.constant dense<0.000000e+00> : vector<1x384xf32>
      %77 = tpu.matmul %arg20, %76, %cst_52 {dimension_numbers = #tpu.dot_dimension_numbers<[1], [0], [0], [1], [0, 0, 1, 1], [], []>} : vector<1x128xf32>, vector<128x384xf32>, vector<1x384xf32> -> vector<1x384xf32>
      %78 = vector.extract_strided_slice %75 {offsets = [0, 0], sizes = [1, 128], strides = [1, 1]} : vector<1x384xf32> to vector<1x128xf32>
      %79 = vector.extract_strided_slice %77 {offsets = [0, 0], sizes = [1, 128], strides = [1, 1]} : vector<1x384xf32> to vector<1x128xf32>
      %80 = arith.addf %78, %79 : vector<1x128xf32>
      %81 = arith.negf %80 : vector<1x128xf32>
      %82 = math.exp %81 : vector<1x128xf32>
      %cst_53 = arith.constant 1.000000e+00 : f32
      %83 = vector.broadcast %cst_53 : f32 to vector<1x128xf32>
      %84 = arith.addf %83, %82 : vector<1x128xf32>
      %85 = arith.divf %83, %84 : vector<1x128xf32>
      %86 = vector.extract_strided_slice %75 {offsets = [0, 128], sizes = [1, 128], strides = [1, 1]} : vector<1x384xf32> to vector<1x128xf32>
      %87 = vector.extract_strided_slice %77 {offsets = [0, 128], sizes = [1, 128], strides = [1, 1]} : vector<1x384xf32> to vector<1x128xf32>
      %88 = arith.addf %86, %87 : vector<1x128xf32>
      %89 = arith.negf %88 : vector<1x128xf32>
      %90 = math.exp %89 : vector<1x128xf32>
      %cst_54 = arith.constant 1.000000e+00 : f32
      %91 = vector.broadcast %cst_54 : f32 to vector<1x128xf32>
      %92 = arith.addf %91, %90 : vector<1x128xf32>
      %93 = arith.divf %91, %92 : vector<1x128xf32>
      %94 = vector.extract_strided_slice %75 {offsets = [0, 256], sizes = [1, 128], strides = [1, 1]} : vector<1x384xf32> to vector<1x128xf32>
      %95 = vector.extract_strided_slice %77 {offsets = [0, 256], sizes = [1, 128], strides = [1, 1]} : vector<1x384xf32> to vector<1x128xf32>
      %c0_55 = arith.constant 0 : index
      %c0_56 = arith.constant 0 : index
      %96 = vector.load %arg10[%c0_55, %c0_56] : memref<1x128xf32, #tpu.memory_space<vmem>>, vector<1x128xf32>
      %97 = arith.addf %95, %96 : vector<1x128xf32>
      %98 = arith.mulf %85, %97 : vector<1x128xf32>
      %99 = arith.addf %94, %98 : vector<1x128xf32>
      %100 = math.tanh %99 : vector<1x128xf32>
      %cst_57 = arith.constant 1.000000e+00 : f32
      %101 = vector.broadcast %cst_57 : f32 to vector<1x128xf32>
      %102 = arith.subf %101, %93 : vector<1x128xf32>
      %103 = arith.mulf %102, %100 : vector<1x128xf32>
      %104 = arith.mulf %93, %arg20 : vector<1x128xf32>
      %105 = arith.addf %103, %104 : vector<1x128xf32>
      %106 = arith.index_cast %arg18 : i32 to index
      %c0_58 = arith.constant 0 : index
      %107 = vector.load %arg16[%106, %c0_58] : memref<8x128xf32, #tpu.memory_space<vmem>>, vector<1x128xf32>
      tpu.vector_store %arg16[%106, %c0_58], %105 {strides = array<i32>} : memref<8x128xf32, #tpu.memory_space<vmem>>, vector<1x128xf32>,
      scf.yield %71, %105 : vector<1x128xf32>, vector<1x128xf32>
    }
    %c0_17 = arith.constant 0 : index
    %c0_18 = arith.constant 0 : index
    %19 = vector.load %arg17[%c0_17, %c0_18] : memref<2x128xf32, #tpu.memory_space<vmem>>, vector<1x128xf32>
    tpu.vector_store %arg17[%c0_17, %c0_18], %18#0 {strides = array<i32>} : memref<2x128xf32, #tpu.memory_space<vmem>>, vector<1x128xf32>,
    %c1_19 = arith.constant 1 : index
    %c0_20 = arith.constant 0 : index
    %20 = vector.load %arg17[%c1_19, %c0_20] : memref<2x128xf32, #tpu.memory_space<vmem>>, vector<1x128xf32>
    tpu.vector_store %arg17[%c1_19, %c0_20], %18#1 {strides = array<i32>} : memref<2x128xf32, #tpu.memory_space<vmem>>, vector<1x128xf32>,
    %c0_21 = arith.constant 0 : index
    %c0_22 = arith.constant 0 : index
    %21 = vector.load %arg17[%c0_21, %c0_22] : memref<2x128xf32, #tpu.memory_space<vmem>>, vector<2x128xf32>
    %c0_23 = arith.constant 0 : index
    %c0_24 = arith.constant 0 : index
    %22 = vector.load %arg14[%c0_23, %c0_24] : memref<2x128xf32, #tpu.memory_space<vmem>>, vector<2x128xf32>
    tpu.vector_store %arg14[%c0_23, %c0_24], %21 {strides = array<i32>} : memref<2x128xf32, #tpu.memory_space<vmem>>, vector<2x128xf32>,
    %c0_25 = arith.constant 0 : index
    %c0_26 = arith.constant 0 : index
    %23 = vector.load %arg16[%c0_25, %c0_26] : memref<8x128xf32, #tpu.memory_space<vmem>>, vector<8x128xf32>
    %c0_27 = arith.constant 0 : index
    %c0_28 = arith.constant 0 : index
    %24 = vector.load %arg11[%c0_27, %c0_28] : memref<128x128xf32, #tpu.memory_space<vmem>>, vector<128x128xf32>
    %cst_29 = arith.constant dense<0.000000e+00> : vector<8x128xf32>
    %25 = tpu.matmul %23, %24, %cst_29 {dimension_numbers = #tpu.dot_dimension_numbers<[1], [0], [0], [1], [0, 0, 1, 1], [], []>} : vector<8x128xf32>, vector<128x128xf32>, vector<8x128xf32> -> vector<8x128xf32>
    %c0_30 = arith.constant 0 : index
    %c0_31 = arith.constant 0 : index
    %26 = vector.load %arg12[%c0_30, %c0_31] : memref<1x128xf32, #tpu.memory_space<vmem>>, vector<1x128xf32>
    %27 = vector.broadcast %26 : vector<1x128xf32> to vector<8x128xf32>
    %28 = arith.addf %25, %27 : vector<8x128xf32>
    %cst_32 = arith.constant dense<0xFF800000> : vector<8xf32>
    %29 = vector.multi_reduction <maximumf>, %28, %cst_32 [1] : vector<8x128xf32> to vector<8xf32>
    %30 = vector.shape_cast %29 : vector<8xf32> to vector<8x1xf32>
    %31 = vector.broadcast %30 : vector<8x1xf32> to vector<8x128xf32>
    %32 = arith.subf %28, %31 : vector<8x128xf32>
    %33 = math.exp %32 : vector<8x128xf32>
    %cst_33 = arith.constant dense<0.000000e+00> : vector<8xf32>
    %34 = vector.multi_reduction <add>, %33, %cst_33 [1] : vector<8x128xf32> to vector<8xf32>
    %35 = vector.shape_cast %34 : vector<8xf32> to vector<8x1xf32>
    %36 = math.log %35 : vector<8x1xf32>
    %37 = vector.broadcast %36 : vector<8x1xf32> to vector<8x128xf32>
    %38 = arith.subf %32, %37 : vector<8x128xf32>
    %c0_34 = arith.constant 0 : index
    %c0_35 = arith.constant 0 : index
    %39 = vector.load %arg13[%c0_34, %c0_35] : memref<8x128xf32, #tpu.memory_space<vmem>>, vector<8x128xf32>
    tpu.vector_store %arg13[%c0_34, %c0_35], %38 {strides = array<i32>} : memref<8x128xf32, #tpu.memory_space<vmem>>, vector<8x128xf32>,
    return
  }
  func.func @transform_0(%arg0: i32) -> (i32, i32) {
    %c0_i32 = arith.constant 0 : i32
    %c0_i32_0 = arith.constant 0 : i32
    return %arg0, %c0_i32 : i32, i32
  }
  func.func @transform_1(%arg0: i32) -> (i32, i32) {
    %c0_i32 = arith.constant 0 : i32
    %c0_i32_0 = arith.constant 0 : i32
    %c0_i32_1 = arith.constant 0 : i32
    return %c0_i32, %c0_i32_0 : i32, i32
  }
  func.func @transform_2(%arg0: i32) -> (i32, i32) {
    %c0_i32 = arith.constant 0 : i32
    %c0_i32_0 = arith.constant 0 : i32
    %c0_i32_1 = arith.constant 0 : i32
    return %c0_i32, %c0_i32_0 : i32, i32
  }
  func.func @transform_3(%arg0: i32) -> (i32, i32) {
    %c0_i32 = arith.constant 0 : i32
    %c0_i32_0 = arith.constant 0 : i32
    %c0_i32_1 = arith.constant 0 : i32
    return %c0_i32, %c0_i32_0 : i32, i32
  }
  func.func @transform_4(%arg0: i32) -> (i32, i32) {
    %c0_i32 = arith.constant 0 : i32
    %c0_i32_0 = arith.constant 0 : i32
    %c0_i32_1 = arith.constant 0 : i32
    return %c0_i32, %c0_i32_0 : i32, i32
  }
  func.func @transform_5(%arg0: i32) -> (i32, i32) {
    %c0_i32 = arith.constant 0 : i32
    %c0_i32_0 = arith.constant 0 : i32
    %c0_i32_1 = arith.constant 0 : i32
    return %c0_i32, %c0_i32_0 : i32, i32
  }
  func.func @transform_6(%arg0: i32) -> (i32, i32) {
    %c0_i32 = arith.constant 0 : i32
    %c0_i32_0 = arith.constant 0 : i32
    %c0_i32_1 = arith.constant 0 : i32
    return %c0_i32, %c0_i32_0 : i32, i32
  }
  func.func @transform_7(%arg0: i32) -> (i32, i32) {
    %c0_i32 = arith.constant 0 : i32
    %c0_i32_0 = arith.constant 0 : i32
    %c0_i32_1 = arith.constant 0 : i32
    return %c0_i32, %c0_i32_0 : i32, i32
  }
  func.func @transform_8(%arg0: i32) -> (i32, i32) {
    %c0_i32 = arith.constant 0 : i32
    %c0_i32_0 = arith.constant 0 : i32
    %c0_i32_1 = arith.constant 0 : i32
    return %c0_i32, %c0_i32_0 : i32, i32
  }
  func.func @transform_9(%arg0: i32) -> (i32, i32) {
    %c0_i32 = arith.constant 0 : i32
    %c0_i32_0 = arith.constant 0 : i32
    %c0_i32_1 = arith.constant 0 : i32
    return %c0_i32, %c0_i32_0 : i32, i32
  }
  func.func @transform_10(%arg0: i32) -> (i32, i32) {
    %c0_i32 = arith.constant 0 : i32
    %c0_i32_0 = arith.constant 0 : i32
    %c0_i32_1 = arith.constant 0 : i32
    return %c0_i32, %c0_i32_0 : i32, i32
  }
  func.func @transform_11(%arg0: i32) -> (i32, i32) {
    %c0_i32 = arith.constant 0 : i32
    %c0_i32_0 = arith.constant 0 : i32
    %c0_i32_1 = arith.constant 0 : i32
    return %c0_i32, %c0_i32_0 : i32, i32
  }
  func.func @transform_12(%arg0: i32) -> (i32, i32) {
    %c0_i32 = arith.constant 0 : i32
    %c0_i32_0 = arith.constant 0 : i32
    return %arg0, %c0_i32 : i32, i32
  }
  func.func @transform_13(%arg0: i32) -> (i32, i32) {
    %c0_i32 = arith.constant 0 : i32
    %c0_i32_0 = arith.constant 0 : i32
    %c0_i32_1 = arith.constant 0 : i32
    return %c0_i32, %c0_i32_0 : i32, i32
  }
}

</mosaic_0001>

<bundles_post_ra>
// kernel: tpu_custom_call.1
= control target key start
LH: loop header
LB: loop body
LE: loop exit
PB: predicated region body
PF: predicated region fallthrough
CT: control target
= control target key end

     0   :  { %19 = vsyncpa [#allocation6], 0  ;;  %s2203_s0 = inlined_call_operand.hbm [shape: f32[8,32], index: 0, kind: input, shape index: {}]   ;;  %s2204_s1 = inlined_call_operand.hbm [shape: f32[2,128], index: 1, kind: input, shape index: {}]   ;;  %s2205_s2 = inlined_call_operand.hbm [shape: f32[32,384], index: 2, kind: input, shape index: {}]   ;;  %s2206_s3 = inlined_call_operand.hbm [shape: f32[128,384], index: 3, kind: input, shape index: {}]   ;;  %s2207_s4 = inlined_call_operand.vmem [shape: f32[1,384], index: 4, kind: input, shape index: {}]   ;;  %s2208_s5 = inlined_call_operand.vmem [shape: f32[1,128], index: 5, kind: input, shape index: {}]   ;;  %s2209_s6 = inlined_call_operand.hbm [shape: f32[128,384], index: 6, kind: input, shape index: {}]   ;;  %s2210_s7 = inlined_call_operand.hbm [shape: f32[128,384], index: 7, kind: input, shape index: {}]   ;;  %s2211_s8 = inlined_call_operand.vmem [shape: f32[1,384], index: 8, kind: input, shape index: {}]   ;;  %s2212_s9 = inlined_call_operand.vmem [shape: f32[1,128], index: 9, kind: input, shape index: {}]   ;;  %s2213_s10 = inlined_call_operand.hbm [shape: f32[128,128], index: 10, kind: input, shape index: {}]   ;;  %s2214_s11 = inlined_call_operand.vmem [shape: f32[1,128], index: 11, kind: input, shape index: {}]   ;;  %s2215_s12 = inlined_call_operand.hbm [shape: f32[8,128], index: 12, kind: output, shape index: {0}]   ;;  %s2216_s13 = inlined_call_operand.hbm [shape: f32[2,128], index: 13, kind: output, shape index: {1}]  }
   0x1   :  { %20 = vsyncpa [#allocation9], 0 }
   0x2   :  { %21 = vsyncpa [#allocation12], 0 }
   0x3   :  { %22 = vsyncpa [#allocation15], 0 }
   0x4   :  { %23 = vsyncpa [#allocation7], 0 }
   0x5   :  { %24 = vsyncpa [#allocation19], 0  ;;  %s1876_s25 = smov [#allocation8]   ;;  %s1642_s29 = scalar_lea.hbm %s2204_s1, 32 }
   0x6   :  { %s41_s26 = sshll.u32 %s1876_s25, 4  ;;  %p1643_p0 = scmp.ne.s32.totalorder %s2204_s1, %s1642_s29  ;;  %s42_s26 = int_to_ptr.vmem [resolvable:$true] %s41_s26 }
   0x7   :  { %p1646_p1 = scmp.lt.u32.totalorder %s1642_s29, %s2204_s1 }
   0x9   :  { %p1648_p2 = pnand %p1646_p1, %p1643_p0 }
   0xb   :  { %1651 = shalt.err (!%p1648_p2)
}
   0xc   :  { %s1652_s17 = scalar_lea.vmem %s42_s26, 32  ;;  %p1657_p4 = scmp.lt.s32.totalorder %s42_s26, %s42_s26 }
   0xd   :  { %p1653_p3 = scmp.ne.s32.totalorder %s42_s26, %s1652_s17  ;;  %p1658_p5 = scmp.lt.s32.totalorder %s1652_s17, %s1652_s17 }
   0xf   :  { %p1659_p6 = por %p1658_p5, %p1657_p4 }
  0x11   :  { %p1660_p7 = pnand %p1659_p6, %p1653_p3 }
  0x13   :  { %1663 = shalt.err (!%p1660_p7)
}
  0x14   :  { %44 = dma.hbm_to_vmem [thread:$0]  %s2204_s1, 32, %s42_s26, [#allocation9]  }
  0x15   :  { %s1877_s20 = smov [#allocation11]   ;;  %s1878_s22 = smov [#allocation14]  }
  0x16   :  { %s62_s21 = sshll.u32 %s1877_s20, 4  ;;  %s90_s23 = sshll.u32 %s1878_s22, 4  ;;  %s63_s21 = int_to_ptr.vmem [resolvable:$true] %s62_s21  ;;  %s91_s23 = int_to_ptr.vmem [resolvable:$true] %s90_s23 }
  0x17   :  { %s1664_s27 = scalar_lea.hbm %s2206_s3, 6144 }
  0x18   :  { %p1665_p8 = scmp.ne.s32.totalorder %s2206_s3, %s1664_s27  ;;  %p1668_p9 = scmp.lt.u32.totalorder %s1664_s27, %s2206_s3 }
  0x1a   :  { %p1670_p10 = pnand %p1668_p9, %p1665_p8 }
  0x1c   :  { %1673 = shalt.err (!%p1670_p10)
}
  0x1d   :  { %s1674_s1 = scalar_lea.vmem %s63_s21, 6144  ;;  %p1679_p12 = scmp.lt.s32.totalorder %s63_s21, %s63_s21 }
  0x1e   :  { %p1675_p11 = scmp.ne.s32.totalorder %s63_s21, %s1674_s1  ;;  %p1680_p13 = scmp.lt.s32.totalorder %s1674_s1, %s1674_s1 }
  0x20   :  { %p1681_p0 = por %p1680_p13, %p1679_p12 }
  0x22   :  { %p1682_p1 = pnand %p1681_p0, %p1675_p11 }
  0x24   :  { %1685 = shalt.err (!%p1682_p1)
}
  0x25   :  { %s1879_s26 = smov 384   ;;  %s1880_s15 = smov 24  }
  0x26   :  { %68 = dma.hbm_to_vmem [thread:$0]  %s2206_s3, 6144, %s63_s21, [#allocation12], %s1879_s26, %s1879_s26, %s1880_s15  }
  0x27   :  { %s1686_s20 = scalar_lea.hbm %s2210_s7, 6144 }
  0x28   :  { %p1687_p2 = scmp.ne.s32.totalorder %s2210_s7, %s1686_s20  ;;  %p1690_p3 = scmp.lt.u32.totalorder %s1686_s20, %s2210_s7 }
  0x2a   :  { %p1692_p4 = pnand %p1690_p3, %p1687_p2 }
  0x2c   :  { %1695 = shalt.err (!%p1692_p4)
}
  0x2d   :  { %s1696_s28 = scalar_lea.vmem %s91_s23, 6144  ;;  %p1701_p6 = scmp.lt.s32.totalorder %s91_s23, %s91_s23 }
  0x2e   :  { %p1697_p5 = scmp.ne.s32.totalorder %s91_s23, %s1696_s28  ;;  %p1702_p7 = scmp.lt.s32.totalorder %s1696_s28, %s1696_s28 }
  0x30   :  { %p1703_p8 = por %p1702_p7, %p1701_p6 }
  0x32   :  { %p1704_p9 = pnand %p1703_p8, %p1697_p5 }
  0x34   :  { %1707 = shalt.err (!%p1704_p9)
}
  0x35   :  { %96 = dma.hbm_to_vmem [thread:$0]  %s2210_s7, 6144, %s91_s23, [#allocation15], %s1879_s26, %s1879_s26, %s1880_s15  }
  0x36   :  { %s1881_s29 = smov [#allocation5]   ;;  %s1882_s14 = smov [#allocation10]  }
  0x37   :  { %s31_s30 = sshll.u32 %s1881_s29, 4  ;;  %s50_s1 = sshll.u32 %s1882_s14, 4  ;;  %s32_s30 = int_to_ptr.vmem [resolvable:$true] %s31_s30  ;;  %s51_s1 = int_to_ptr.vmem [resolvable:$true] %s50_s1 }
  0x38   :  { %s1708_s18 = scalar_lea.hbm %s2203_s0, 128 }
  0x39   :  { %p1709_p10 = scmp.ne.s32.totalorder %s2203_s0, %s1708_s18  ;;  %p1712_p11 = scmp.lt.u32.totalorder %s1708_s18, %s2203_s0 }
  0x3b   :  { %p1714_p12 = pnand %p1712_p11, %p1709_p10 }
  0x3d   :  { %1717 = shalt.err (!%p1714_p12)
}
  0x3e   :  { %s1718_s7 = scalar_lea.vmem %s32_s30, 128  ;;  %p1723_p0 = scmp.lt.s32.totalorder %s32_s30, %s32_s30 }
  0x3f   :  { %p1719_p13 = scmp.ne.s32.totalorder %s32_s30, %s1718_s7  ;;  %p1724_p1 = scmp.lt.s32.totalorder %s1718_s7, %s1718_s7 }
  0x41   :  { %p1725_p2 = por %p1724_p1, %p1723_p0 }
  0x43   :  { %p1726_p3 = pnand %p1725_p2, %p1719_p13 }
  0x45   :  { %1729 = shalt.err (!%p1726_p3)
}
  0x46   :  { %34 = dma.hbm_to_vmem [thread:$0]  %s2203_s0, 128, %s32_s30, [#allocation6]  }
  0x47   :  { %s1730_s3 = scalar_lea.hbm %s2205_s2, 1536 }
  0x48   :  { %p1731_p4 = scmp.ne.s32.totalorder %s2205_s2, %s1730_s3  ;;  %p1734_p5 = scmp.lt.u32.totalorder %s1730_s3, %s2205_s2 }
  0x4a   :  { %p1736_p6 = pnand %p1734_p5, %p1731_p4 }
  0x4c   :  { %1739 = shalt.err (!%p1736_p6)
}
  0x4d   :  { %s1740_s17 = scalar_lea.vmem %s51_s1, 1536  ;;  %p1745_p8 = scmp.lt.s32.totalorder %s51_s1, %s51_s1 }
  0x4e   :  { %p1741_p7 = scmp.ne.s32.totalorder %s51_s1, %s1740_s17  ;;  %p1746_p9 = scmp.lt.s32.totalorder %s1740_s17, %s1740_s17 }
  0x50   :  { %p1747_p10 = por %p1746_p9, %p1745_p8 }
  0x52   :  { %p1748_p11 = pnand %p1747_p10, %p1741_p7 }
  0x54   :  { %1751 = shalt.err (!%p1748_p11)
}
  0x55   :  { %56 = dma.hbm_to_vmem [thread:$0]  %s2205_s2, 1536, %s51_s1, [#allocation9], %s1879_s26, %s1879_s26, %s1880_s15  }
  0x56   :  { %s1883_s18 = smov [#allocation13]   ;;  %s1884_s20 = smov [#allocation16]  }
  0x57   :  { %s78_s19 = sshll.u32 %s1883_s18, 4  ;;  %s106_s22 = sshll.u32 %s1884_s20, 4  ;;  %s79_s19 = int_to_ptr.vmem [resolvable:$true] %s78_s19  ;;  %s107_s22 = int_to_ptr.vmem [resolvable:$true] %s106_s22 }
  0x58   :  { %s1752_s23 = scalar_lea.hbm %s2209_s6, 6144 }
  0x59   :  { %p1753_p12 = scmp.ne.s32.totalorder %s2209_s6, %s1752_s23  ;;  %p1756_p13 = scmp.lt.u32.totalorder %s1752_s23, %s2209_s6 }
  0x5b   :  { %p1758_p0 = pnand %p1756_p13, %p1753_p12 }
  0x5d   :  { %1761 = shalt.err (!%p1758_p0)
}
  0x5e   :  { %s1762_s2 = scalar_lea.vmem %s79_s19, 6144  ;;  %p1767_p2 = scmp.lt.s32.totalorder %s79_s19, %s79_s19 }
  0x5f   :  { %p1763_p1 = scmp.ne.s32.totalorder %s79_s19, %s1762_s2  ;;  %p1768_p3 = scmp.lt.s32.totalorder %s1762_s2, %s1762_s2 }
  0x61   :  { %p1769_p4 = por %p1768_p3, %p1767_p2 }
  0x63   :  { %p1770_p5 = pnand %p1769_p4, %p1763_p1 }
  0x65   :  { %1773 = shalt.err (!%p1770_p5)
}
  0x66   :  { %84 = dma.hbm_to_vmem [thread:$0]  %s2209_s6, 6144, %s79_s19, [#allocation12], %s1879_s26, %s1879_s26, %s1880_s15  }
  0x67   :  { %s1774_s16 = scalar_lea.hbm %s2213_s10, 2048 }
  0x68   :  { %p1775_p6 = scmp.ne.s32.totalorder %s2213_s10, %s1774_s16  ;;  %p1778_p7 = scmp.lt.u32.totalorder %s1774_s16, %s2213_s10 }
  0x6a   :  { %p1780_p8 = pnand %p1778_p7, %p1775_p6 }
  0x6c   :  { %1783 = shalt.err (!%p1780_p8)
}
  0x6d   :  { %s1784_s20 = scalar_lea.vmem %s107_s22, 2048  ;;  %p1789_p10 = scmp.lt.s32.totalorder %s107_s22, %s107_s22 }
  0x6e   :  { %p1785_p9 = scmp.ne.s32.totalorder %s107_s22, %s1784_s20  ;;  %p1790_p11 = scmp.lt.s32.totalorder %s1784_s20, %s1784_s20 }
  0x70   :  { %p1791_p12 = por %p1790_p11, %p1789_p10 }
  0x72   :  { %p1792_p13 = pnand %p1791_p12, %p1785_p9 }
  0x74   :  { %1795 = shalt.err (!%p1792_p13)
}
  0x75   :  { %s1885_s6 = smov 128   ;;  %s1886_s26 = smov 8  }
  0x76   :  { %112 = dma.hbm_to_vmem [thread:$0]  %s2213_s10, 2048, %s107_s22, [#allocation15], %s1885_s6, %s1885_s6, %s1886_s26  }
  0x77   :  { %1852 = dma.done.wait [#allocation6], 128  }
  0x78   :  { %1853 = vsyncadd [#allocation6], 4294967168 }
  0x79   :  { %1854 = dma.done.wait [#allocation9], 1568  }
  0x7a   :  { %1855 = vsyncadd [#allocation9], 4294965728 }
  0x7b   :  { %1856 = dma.done.wait [#allocation12], 12288  }
  0x7c   :  { %1857 = vsyncadd [#allocation12], 4294955008 }
  0x7d   :  { %1858 = dma.done.wait [#allocation15], 8192  }
  0x7e   :  { %1859 = vsyncadd [#allocation15], 4294959104  ;;  %v1887_v0 = vmov 0.0|0.0   ;;  %v1888_v1 = vmov 0.0   ;;  %vm1889_vm0 = vmmov 0   ;;  %v144_v3 = vld [vmem:[#allocation10 + $0x8] sm:$0xff]  ;;  %v157_v24 = vlaneseq }
  0x7f   :  { %1373 = vmatprep.subr.bf16.mxu1 %v1887_v0  ;;  %240 = vmatprep.mubr.f32.mxu0 %v1888_v1  ;;  %320 = vst [vmem:[#allocation3] sm:$0xff] %v1888_v1  ;;  %v140_v2 = vld [vmem:[#allocation8] sm:$0x3]  ;;  %v147_v4 = vld [vmem:[#allocation10 + $0x20] sm:$0xff]  ;;  %v145_v8 = vld [vmem:[#allocation10 + $0x10] sm:$0xff]  ;;  %vm172_vm1 = vcmask 261120  }
  0x80   :  { %1222 = vmatprep.mubr.msk.f32.mxu1 %vm1889_vm0, %v1888_v1  ;;  %141 = vst [vmem:[#allocation4] sm:$0x3] %v140_v2  ;;  %v1365_v5 = vpack.c.bf16 %v147_v4, %v144_v3  ;;  %v143_v6 = vld [vmem:[#allocation10] sm:$0xff]  ;;  %v146_v7 = vld [vmem:[#allocation10 + $0x18] sm:$0xff]  ;;  %v148_v10 = vld [vmem:[#allocation10 + $0x28] sm:$0xff]  ;;  %v2067_v25 = vshrl.u32 %v157_v24, 7 }
  0x81   :  { %v1367_v9 = vpack.c.bf16 %v146_v7, %v143_v6  ;;  %v150_v11 = vld [vmem:[#allocation10 + $0x38] sm:$0xff]  ;;  %v153_v12 = vld [vmem:[#allocation10 + $0x50] sm:$0xff]  ;;  %v1374_v13 = vpack.c.bf16 %v148_v10, %v145_v8  ;;  %v152_v16 = vld [vmem:[#allocation10 + $0x48] sm:$0xff] }
  0x82   :  { %1366 = vmatprep.subr.bf16.mxu0 %v1365_v5  ;;  %v1369_v14 = vpack.c.bf16 %v153_v12, %v150_v11  ;;  %v149_v15 = vld [vmem:[#allocation10 + $0x30] sm:$0xff]  ;;  %v151_v17 = vld [vmem:[#allocation10 + $0x40] sm:$0xff]  ;;  %v154_v19 = vld [vmem:[#allocation10 + $0x58] sm:$0xff]  ;;  %v159_v26 = vsub.s32 0, %v2067_v25  ;;  %v167_v28 = vsub.s32 2, %v2067_v25  ;;  %v163_v29 = vsub.s32 1, %v2067_v25 }
  0x83   :  { %1368 = vmatpush1.bf16.msra.mxu0 %v1367_v9  ;;  %v1371_v18 = vpack.c.bf16 %v152_v16, %v149_v15  ;;  %1375 = vmatpush3.bf16.msra.mxu1 %v1374_v13  ;;  %v1377_v20 = vpack.c.bf16 %v154_v19, %v151_v17  ;;  %v142_v23 = vld [vmem:[#allocation5] sm:$0xff] }
  0x84   :  { %1370 = vmatprep.subr.bf16.mxu0 %v1369_v14  ;;  %1376 = vmatprep.subr.bf16.mxu1 %v1887_v0  ;;  %v155_v27 = vld [vmem:[%s2207_s4] sm:$0x7]  ;;  %s2085_s4 = smov 0  }
  0x85   :  { %v160_v30 = vrot.slane %v155_v27, %v159_v26  ;;  %v168_v31 = vrot.slane %v155_v27, %v167_v28  ;;  %v164_v32 = vrot.slane %v155_v27, %v163_v29 }
  0x87   :  { %v321_v21 = vld [vmem:[#allocation4] sm:$0x1]   ;;  %v322_v22 = vld [vmem:[#allocation4 + $0x1] sm:$0x1]   ;;  %1372 = vmatpush1.bf16.msra.mxu0 %v1371_v18  ;;  %1378 = vmatpush3.bf16.msra.mxu1 %v1377_v20 }
  0x8a   :  { %1133 = vmatmul.mubr.msk.f32.vlgmr.msra.gmra.mrb[0].mxu0 %vm172_vm1, %v142_v23  ;;  %1223 = vmatmul.mubr.msk.f32.vlgmr.msra.gmra.mrb[0].mxu1 %vm172_vm1, %v142_v23 }
 0x15d   :  { %v242_v33 = vpop.f32.mrb[0].mxu0  ;;  %v313_v35 = vpop.f32.mrb[0].mxu1 }
 0x15e   :  { %v243_v34 = vadd.f32 %v242_v33, %v160_v30  ;;  %v244_v36 = vpop.f32.mrb[1].mxu0  ;;  %v314_v37 = vadd.f32 %v313_v35, %v168_v31  ;;  %v1224_v39 = vpop.f32.mrb[1].mxu1 }
 0x15f   :  { %v245_v38 = vadd.f32 %v244_v36, %v164_v32 }
 0x160   :  { %317 = vst [vmem:[#allocation2] sm:$0xff] %v243_v34  ;;  %319 = vst [vmem:[#allocation2 + $0x10] sm:$0xff] %v314_v37 }
 0x161   :  { %318 = vst [vmem:[#allocation2 + $0x8] sm:$0xff] %v245_v38 }
 0x162 LB: > { %v341_v40 = vld [vmem:[#allocation11 + $0x8] sm:$0xff]  ;;  %v344_v41 = vld [vmem:[#allocation11 + $0x20] sm:$0xff]  ;;  %v343_v44 = vld [vmem:[#allocation11 + $0x18] sm:$0xff]  ;;  %v1890_v47 = vmov 0.0|0.0   ;;  %v1891_v48 = vmov 0.0   ;;  %vm1892_vm2 = vmmov 0   ;;  %s1874_s4 = sphi %s2085_s4, %s328_s4   ;;  %v1870_v21 = vphi %v321_v21, %v2219_v21   ;;  %v1866_v22 = vphi %v322_v22, %v2218_v22  }
 0x163   : > { %v340_v42 = vld [vmem:[#allocation11] sm:$0xff]  ;;  %v1379_v43 = vpack.c.bf16 %v344_v41, %v341_v40  ;;  %v347_v45 = vld [vmem:[#allocation11 + $0x38] sm:$0xff]  ;;  %v350_v46 = vld [vmem:[#allocation11 + $0x50] sm:$0xff]  ;;  %1411 = vmatprep.subr.bf16.mxu1 %v1890_v47  ;;  %452 = vmatprep.mubr.f32.mxu0 %v1891_v48  ;;  %s331_s24 = sshra.s32 %s1874_s4, 3  ;;  %s334_s23 = sand.u32 7, %s1874_s4 }
 0x164   : > { %v1381_v49 = vpack.c.bf16 %v343_v44, %v340_v42  ;;  %v1383_v50 = vpack.c.bf16 %v350_v46, %v347_v45  ;;  %v346_v51 = vld [vmem:[#allocation11 + $0x30] sm:$0xff]  ;;  %v349_v52 = vld [vmem:[#allocation11 + $0x48] sm:$0xff]  ;;  %1257 = vmatprep.mubr.msk.f32.mxu1 %vm1892_vm2, %v1891_v48  ;;  %v356_v54 = vld [vmem:[#allocation11 + $0x80] sm:$0xff]  ;;  %s1135_s7 = smul.u32 24, %s331_s24  ;;  %s975_s14 = scalar_lea.vmem [#allocation3], %s1874_s4 }
 0x165   : > { %v353_v53 = vld [vmem:[#allocation11 + $0x68] sm:$0xff]  ;;  %1380 = vmatprep.subr.bf16.mxu0 %v1379_v43  ;;  %v1385_v55 = vpack.c.bf16 %v349_v52, %v346_v51  ;;  %v352_v57 = vld [vmem:[#allocation11 + $0x60] sm:$0xff]  ;;  %v355_v58 = vld [vmem:[#allocation11 + $0x78] sm:$0xff]  ;;  %s328_s4 = sadd.s32 1, %s1874_s4  }
 0x166   : > { %1382 = vmatpush1.bf16.msra.mxu0 %v1381_v49  ;;  %v1387_v56 = vpack.c.bf16 %v356_v54, %v353_v53  ;;  %v359_v59 = vld [vmem:[#allocation11 + $0x98] sm:$0xff]  ;;  %v362_v60 = vld [vmem:[#allocation11 + $0xb0] sm:$0xff]  ;;  %v1389_v61 = vpack.c.bf16 %v355_v58, %v352_v57  ;;  %v361_v2 = vld [vmem:[#allocation11 + $0xa8] sm:$0xff]  ;;  %s337_s25 = sadd.s32 %s1135_s7, %s334_s23  ;;  %p325_p0 = scmp.ge.s32.totalorder %s328_s4, 8  }
 0x167   : > { %1384 = vmatprep.subr.bf16.mxu0 %v1383_v50  ;;  %v358_v62 = vld [vmem:[#allocation11 + $0x90] sm:$0xff]  ;;  %v1391_v63 = vpack.c.bf16 %v362_v60, %v359_v59  ;;  %v345_v4 = vld [vmem:[#allocation11 + $0x28] sm:$0xff]  ;;  %v368_v6 = vld [vmem:[#allocation11 + $0xe0] sm:$0xff]  ;;  %s338_s27 = scalar_lea.vmem [#allocation2], %s337_s25 }
 0x168   : > { %v342_v3 = vld [vmem:[#allocation11 + $0x10] sm:$0xff]  ;;  %v365_v5 = vld [vmem:[#allocation11 + $0xc8] sm:$0xff]  ;;  %v348_v8 = vld [vmem:[#allocation11 + $0x40] sm:$0xff]  ;;  %v1393_v10 = vpack.c.bf16 %v361_v2, %v358_v62 }
 0x169   : > { %v1412_v7 = vpack.c.bf16 %v345_v4, %v342_v3  ;;  %v351_v9 = vld [vmem:[#allocation11 + $0x58] sm:$0xff]  ;;  %v364_v11 = vld [vmem:[#allocation11 + $0xc0] sm:$0xff]  ;;  %v1395_v13 = vpack.c.bf16 %v368_v6, %v365_v5  ;;  %v354_v15 = vld [vmem:[#allocation11 + $0x70] sm:$0xff] }
 0x16a   : > { %1386 = vmatpush1.bf16.msra.mxu0 %v1385_v55  ;;  %v1415_v12 = vpack.c.bf16 %v351_v9, %v348_v8  ;;  %v367_v14 = vld [vmem:[#allocation11 + $0xd8] sm:$0xff]  ;;  %v357_v16 = vld [vmem:[#allocation11 + $0x88] sm:$0xff]  ;;  %v374_v18 = vld [vmem:[#allocation11 + $0x110] sm:$0xff] }
 0x16b   : > { %1388 = vmatprep.subr.bf16.mxu0 %v1387_v56  ;;  %1413 = vmatpush3.bf16.msra.mxu1 %v1412_v7  ;;  %v371_v17 = vld [vmem:[#allocation11 + $0xf8] sm:$0xff]  ;;  %v1397_v19 = vpack.c.bf16 %v367_v14, %v364_v11  ;;  %v370_v20 = vld [vmem:[#allocation11 + $0xf0] sm:$0xff]  ;;  %v1418_v23 = vpack.c.bf16 %v357_v16, %v354_v15  ;;  %v373_v27 = vld [vmem:[#allocation11 + $0x108] sm:$0xff] }
 0x16c   : > { %1414 = vmatprep.subr.bf16.mxu1 %v1890_v47  ;;  %v1399_v24 = vpack.c.bf16 %v374_v18, %v371_v17  ;;  %v360_v30 = vld [vmem:[#allocation11 + $0xa0] sm:$0xff]  ;;  %v363_v31 = vld [vmem:[#allocation11 + $0xb8] sm:$0xff]  ;;  %v377_v32 = vld [vmem:[#allocation11 + $0x128] sm:$0xff]  ;;  %v1401_v34 = vpack.c.bf16 %v373_v27, %v370_v20 }
 0x16d   : > { %v380_v33 = vld [vmem:[#allocation11 + $0x140] sm:$0xff]  ;;  %v1421_v36 = vpack.c.bf16 %v363_v31, %v360_v30  ;;  %v379_v38 = vld [vmem:[#allocation11 + $0x138] sm:$0xff]  ;;  %v366_v39 = vld [vmem:[#allocation11 + $0xd0] sm:$0xff] }
 0x16e   : > { %1390 = vmatpush1.bf16.msra.mxu0 %v1389_v61  ;;  %v376_v35 = vld [vmem:[#allocation11 + $0x120] sm:$0xff]  ;;  %v1403_v37 = vpack.c.bf16 %v380_v33, %v377_v32  ;;  %v369_v40 = vld [vmem:[#allocation11 + $0xe8] sm:$0xff]  ;;  %v383_v41 = vld [vmem:[#allocation11 + $0x158] sm:$0xff] }
 0x16f   : > { %1392 = vmatprep.subr.bf16.mxu0 %v1391_v63  ;;  %1416 = vmatpush3.bf16.msra.mxu1 %v1415_v12  ;;  %v386_v42 = vld [vmem:[#allocation11 + $0x170] sm:$0xff]  ;;  %v1405_v43 = vpack.c.bf16 %v379_v38, %v376_v35  ;;  %v1424_v45 = vpack.c.bf16 %v369_v40, %v366_v39  ;;  %v385_v49 = vld [vmem:[#allocation11 + $0x168] sm:$0xff]  ;;  %v372_v50 = vld [vmem:[#allocation11 + $0x100] sm:$0xff] }
 0x170   : > { %1417 = vmatprep.subr.bf16.mxu1 %v1890_v47  ;;  %v382_v44 = vld [vmem:[#allocation11 + $0x150] sm:$0xff]  ;;  %v1407_v46 = vpack.c.bf16 %v386_v42, %v383_v41  ;;  %v375_v51 = vld [vmem:[#allocation11 + $0x118] sm:$0xff]  ;;  %v381_v55 = vld [vmem:[#allocation11 + $0x148] sm:$0xff] }
 0x171   : > { %v1409_v52 = vpack.c.bf16 %v385_v49, %v382_v44  ;;  %v1427_v53 = vpack.c.bf16 %v375_v51, %v372_v50  ;;  %v378_v54 = vld [vmem:[#allocation11 + $0x130] sm:$0xff]  ;;  %v384_v57 = vld [vmem:[#allocation11 + $0x160] sm:$0xff]  ;;  %v387_v58 = vld [vmem:[#allocation11 + $0x178] sm:$0xff] }
 0x172   : > { %1394 = vmatpush1.bf16.msra.mxu0 %v1393_v10  ;;  %v1430_v56 = vpack.c.bf16 %v381_v55, %v378_v54  ;;  %v1433_v59 = vpack.c.bf16 %v387_v58, %v384_v57  ;;  %v558_v60 = vld [vmem:[#allocation13 + $0x8] sm:$0xff]  ;;  %v561_v61 = vld [vmem:[#allocation13 + $0x20] sm:$0xff]  ;;  %v560_v2 = vld [vmem:[#allocation13 + $0x18] sm:$0xff] }
 0x173   : > { %1396 = vmatprep.subr.bf16.mxu0 %v1395_v13  ;;  %1419 = vmatpush3.bf16.msra.mxu1 %v1418_v23  ;;  %v1435_v62 = vpack.c.bf16 %v561_v61, %v558_v60  ;;  %v557_v63 = vld [vmem:[#allocation13] sm:$0xff]  ;;  %v559_v4 = vld [vmem:[#allocation13 + $0x10] sm:$0xff]  ;;  %v562_v5 = vld [vmem:[#allocation13 + $0x28] sm:$0xff] }
 0x174   : > { %1420 = vmatprep.subr.bf16.mxu1 %v1890_v47  ;;  %v1437_v3 = vpack.c.bf16 %v560_v2, %v557_v63  ;;  %v1468_v6 = vpack.c.bf16 %v562_v5, %v559_v4  ;;  %v564_v7 = vld [vmem:[#allocation13 + $0x38] sm:$0xff]  ;;  %v567_v8 = vld [vmem:[#allocation13 + $0x50] sm:$0xff]  ;;  %v566_v11 = vld [vmem:[#allocation13 + $0x48] sm:$0xff] }
 0x175   : > { %v1439_v9 = vpack.c.bf16 %v567_v8, %v564_v7  ;;  %v563_v10 = vld [vmem:[#allocation13 + $0x30] sm:$0xff]  ;;  %v565_v13 = vld [vmem:[#allocation13 + $0x40] sm:$0xff]  ;;  %v568_v14 = vld [vmem:[#allocation13 + $0x58] sm:$0xff] }
 0x176   : > { %1398 = vmatpush1.bf16.msra.mxu0 %v1397_v19  ;;  %v1441_v12 = vpack.c.bf16 %v566_v11, %v563_v10  ;;  %v1471_v15 = vpack.c.bf16 %v568_v14, %v565_v13  ;;  %v570_v16 = vld [vmem:[#allocation13 + $0x68] sm:$0xff]  ;;  %v573_v17 = vld [vmem:[#allocation13 + $0x80] sm:$0xff]  ;;  %v572_v20 = vld [vmem:[#allocation13 + $0x78] sm:$0xff] }
 0x177   : > { %1400 = vmatprep.subr.bf16.mxu0 %v1399_v24  ;;  %1422 = vmatpush3.bf16.msra.mxu1 %v1421_v36  ;;  %v569_v18 = vld [vmem:[#allocation13 + $0x60] sm:$0xff]  ;;  %v1443_v19 = vpack.c.bf16 %v573_v17, %v570_v16  ;;  %v571_v24 = vld [vmem:[#allocation13 + $0x70] sm:$0xff]  ;;  %v574_v27 = vld [vmem:[#allocation13 + $0x88] sm:$0xff] }
 0x178   : > { %1423 = vmatprep.subr.bf16.mxu1 %v1890_v47  ;;  %v1445_v23 = vpack.c.bf16 %v572_v20, %v569_v18  ;;  %v1474_v30 = vpack.c.bf16 %v574_v27, %v571_v24  ;;  %v576_v31 = vld [vmem:[#allocation13 + $0x98] sm:$0xff]  ;;  %v579_v32 = vld [vmem:[#allocation13 + $0xb0] sm:$0xff]  ;;  %v578_v35 = vld [vmem:[#allocation13 + $0xa8] sm:$0xff] }
 0x179   : > { %v1447_v33 = vpack.c.bf16 %v579_v32, %v576_v31  ;;  %v580_v38 = vld [vmem:[#allocation13 + $0xb8] sm:$0xff]  ;;  %v582_v40 = vld [vmem:[#allocation13 + $0xc8] sm:$0xff]  ;;  %v585_v41 = vld [vmem:[#allocation13 + $0xe0] sm:$0xff] }
 0x17a   : > { %1402 = vmatpush1.bf16.msra.mxu0 %v1401_v34  ;;  %v575_v34 = vld [vmem:[#allocation13 + $0x90] sm:$0xff]  ;;  %v1451_v42 = vpack.c.bf16 %v585_v41, %v582_v40  ;;  %v584_v44 = vld [vmem:[#allocation13 + $0xd8] sm:$0xff]  ;;  %v586_v49 = vld [vmem:[#allocation13 + $0xe8] sm:$0xff] }
 0x17b   : > { %1404 = vmatprep.subr.bf16.mxu0 %v1403_v37  ;;  %1425 = vmatpush3.bf16.msra.mxu1 %v1424_v45  ;;  %v1449_v36 = vpack.c.bf16 %v578_v35, %v575_v34  ;;  %v577_v37 = vld [vmem:[#allocation13 + $0xa0] sm:$0xff]  ;;  %v588_v51 = vld [vmem:[#allocation13 + $0xf8] sm:$0xff]  ;;  %v587_v54 = vld [vmem:[#allocation13 + $0xf0] sm:$0xff] }
 0x17c   : > { %1426 = vmatprep.subr.bf16.mxu1 %v1890_v47  ;;  %v1477_v39 = vpack.c.bf16 %v580_v38, %v577_v37  ;;  %v590_v55 = vld [vmem:[#allocation13 + $0x108] sm:$0xff]  ;;  %v592_v58 = vld [vmem:[#allocation13 + $0x118] sm:$0xff]  ;;  %v597_v60 = vld [vmem:[#allocation13 + $0x140] sm:$0xff] }
 0x17d   : > { %v1457_v57 = vpack.c.bf16 %v590_v55, %v587_v54  ;;  %v593_v63 = vld [vmem:[#allocation13 + $0x120] sm:$0xff]  ;;  %v596_v2 = vld [vmem:[#allocation13 + $0x138] sm:$0xff]  ;;  %v598_v5 = vld [vmem:[#allocation13 + $0x148] sm:$0xff] }
 0x17e   : > { %1406 = vmatpush1.bf16.msra.mxu0 %v1405_v43  ;;  %v581_v43 = vld [vmem:[#allocation13 + $0xc0] sm:$0xff]  ;;  %v1461_v4 = vpack.c.bf16 %v596_v2, %v593_v63  ;;  %v603_v7 = vld [vmem:[#allocation13 + $0x170] sm:$0xff]  ;;  %v602_v11 = vld [vmem:[#allocation13 + $0x168] sm:$0xff] }
 0x17f   : > { %1408 = vmatprep.subr.bf16.mxu0 %v1407_v46  ;;  %1428 = vmatpush3.bf16.msra.mxu1 %v1427_v53  ;;  %v1453_v45 = vpack.c.bf16 %v584_v44, %v581_v43  ;;  %v583_v46 = vld [vmem:[#allocation13 + $0xd0] sm:$0xff]  ;;  %v604_v13 = vld [vmem:[#allocation13 + $0x178] sm:$0xff]  ;;  %v764_v14 = vld [vmem:[#allocation14 + $0x8] sm:$0xff] }
 0x180   : > { %1429 = vmatprep.subr.bf16.mxu1 %v1890_v47  ;;  %v1480_v50 = vpack.c.bf16 %v586_v49, %v583_v46  ;;  %v599_v10 = vld [vmem:[#allocation13 + $0x150] sm:$0xff]  ;;  %v763_v46 = vld [vmem:[#allocation14] sm:$0xff]  ;;  %v770_v54 = vld [vmem:[#allocation14 + $0x38] sm:$0xff] }
 0x181   : > { %v1465_v16 = vpack.c.bf16 %v602_v11, %v599_v10  ;;  %v546_v38 = vld [vmem:[%s2208_s5] sm:$0x1]  ;;  %v772_v63 = vld [vmem:[#allocation14 + $0x48] sm:$0xff]  ;;  %v771_v2 = vld [vmem:[#allocation14 + $0x40] sm:$0xff] }
 0x182   : > { %1410 = vmatpush1.bf16.msra.mxu0 %v1409_v52  ;;  %v591_v52 = vld [vmem:[#allocation13 + $0x110] sm:$0xff]  ;;  %v778_v10 = vld [vmem:[#allocation14 + $0x78] sm:$0xff]  ;;  %v780_v11 = vld [vmem:[#allocation14 + $0x88] sm:$0xff] }
 0x183   : > { %1431 = vmatpush3.bf16.msra.mxu1 %v1430_v56  ;;  %1436 = vmatprep.subr.bf16.mxu0 %v1435_v62  ;;  %v1455_v53 = vpack.c.bf16 %v591_v52, %v588_v51  ;;  %v589_v56 = vld [vmem:[#allocation13 + $0x100] sm:$0xff]  ;;  %v765_v51 = vld [vmem:[#allocation14 + $0x10] sm:$0xff]  ;;  %v768_v52 = vld [vmem:[#allocation14 + $0x28] sm:$0xff] }
 0x184   : > { %1432 = vmatprep.subr.bf16.mxu1 %v1890_v47  ;;  %v1483_v61 = vpack.c.bf16 %v592_v58, %v589_v56  ;;  %v773_v55 = vld [vmem:[#allocation14 + $0x50] sm:$0xff] }
 0x185   : > { %453 = vmatmul.mubr.f32.vlgmr.msra.gmra.mrb[0].mxu0 %v1870_v21  ;;  %v988_v25 = vld [vmem:[#allocation16 + $0x30] sm:$0xff] (%p325_p0) }
 0x186   : > { %686 = vmatprep.mubr.f32.mxu0 %v1891_v48  ;;  %1438 = vmatpush1.bf16.msra.mxu0 %v1437_v3  ;;  %v595_v3 = vld [vmem:[#allocation13 + $0x130] sm:$0xff] }
 0x187   : > { %1434 = vmatpush3.bf16.msra.mxu1 %v1433_v59  ;;  %1440 = vmatprep.subr.bf16.mxu0 %v1439_v9  ;;  %v594_v59 = vld [vmem:[#allocation13 + $0x128] sm:$0xff]  ;;  %v1486_v8 = vpack.c.bf16 %v598_v5, %v595_v3  ;;  %v774_v3 = vld [vmem:[#allocation14 + $0x58] sm:$0xff]  ;;  %v779_v5 = vld [vmem:[#allocation14 + $0x80] sm:$0xff] }
 0x188   : > { %1467 = vmatprep.subr.bf16.mxu1 %v1890_v47  ;;  %v1459_v62 = vpack.c.bf16 %v597_v60, %v594_v59  ;;  %v769_v59 = vld [vmem:[#allocation14 + $0x30] sm:$0xff]  ;;  %v1524_v60 = vpack.c.bf16 %v768_v52, %v765_v51  ;;  %v802_v52 = vld [vmem:[#allocation14 + $0x138] sm:$0xff] }
 0x18a   : > { %1258 = vmatmul.mubr.f32.vlgmr.msra.gmra.mrb[0].mxu1 %v1870_v21  ;;  %1442 = vmatpush1.bf16.msra.mxu0 %v1441_v12  ;;  %v601_v12 = vld [vmem:[#allocation13 + $0x160] sm:$0xff] }
 0x18b   : > { %1292 = vmatprep.mubr.msk.f32.mxu1 %vm1892_vm2, %v1891_v48  ;;  %1469 = vmatpush3.bf16.msra.mxu1 %v1468_v6  ;;  %v600_v6 = vld [vmem:[#allocation13 + $0x158] sm:$0xff]  ;;  %v1489_v17 = vpack.c.bf16 %v604_v13, %v601_v12  ;;  %v785_v13 = vld [vmem:[#allocation14 + $0xb0] sm:$0xff] }
 0x18c   : > { %1470 = vmatprep.subr.bf16.mxu1 %v1890_v47  ;;  %1444 = vmatprep.subr.bf16.mxu0 %v1443_v19  ;;  %v1463_v9 = vpack.c.bf16 %v603_v7, %v600_v6  ;;  %v339_v19 = vld [vmem:[%s338_s27] ss:$8 sm:$0x7]  ;;  %v1497_v6 = vpack.c.bf16 %v772_v63, %v769_v59 }
 0x18d   : > { %v549_v41 = vrot.slane %v339_v19, 2  ;;  %v775_v7 = vld [vmem:[#allocation14 + $0x60] sm:$0xff]  ;;  %v782_v12 = vld [vmem:[#allocation14 + $0x98] sm:$0xff] }
 0x18e   : > { %1446 = vmatpush1.bf16.msra.mxu0 %v1445_v23  ;;  %v537_v23 = vrot.slane %v339_v19, 1  ;;  %v807_v63 = vld [vmem:[#allocation14 + $0x160] sm:$0xff] }
 0x18f   : > { %1472 = vmatpush3.bf16.msra.mxu1 %v1471_v15  ;;  %1448 = vmatprep.subr.bf16.mxu0 %v1447_v33  ;;  %v767_v15 = vld [vmem:[#allocation14 + $0x20] sm:$0xff] }
 0x190   : > { %1473 = vmatprep.subr.bf16.mxu1 %v1890_v47  ;;  %v1491_v18 = vpack.c.bf16 %v767_v15, %v764_v14  ;;  %v1501_v14 = vpack.c.bf16 %v778_v10, %v775_v7  ;;  %v781_v15 = vld [vmem:[#allocation14 + $0x90] sm:$0xff] }
 0x191   : > { %v605_v7 = vld [vmem:[%s2211_s8] sm:$0x7] }
 0x192   : > { %1450 = vmatpush1.bf16.msra.mxu0 %v1449_v36  ;;  %v614_v10 = vrot.slane %v605_v7, %v163_v29  ;;  %v991_v29 = vld [vmem:[#allocation16 + $0x48] sm:$0xff] (%p325_p0) }
 0x193   : > { %1475 = vmatpush3.bf16.msra.mxu1 %v1474_v30  ;;  %1452 = vmatprep.subr.bf16.mxu0 %v1451_v42 }
 0x194   : > { %1476 = vmatprep.subr.bf16.mxu1 %v1890_v47 }
 0x196   : > { %1454 = vmatpush1.bf16.msra.mxu0 %v1453_v45 }
 0x197   : > { %1478 = vmatpush3.bf16.msra.mxu1 %v1477_v39  ;;  %1456 = vmatprep.subr.bf16.mxu0 %v1455_v53 }
 0x198   : > { %1479 = vmatprep.subr.bf16.mxu1 %v1890_v47 }
 0x19a   : > { %1458 = vmatpush1.bf16.msra.mxu0 %v1457_v57 }
 0x19b   : > { %1481 = vmatpush3.bf16.msra.mxu1 %v1480_v50  ;;  %1460 = vmatprep.subr.bf16.mxu0 %v1459_v62  ;;  %v766_v50 = vld [vmem:[#allocation14 + $0x18] sm:$0xff]  ;;  %v1495_v62 = vpack.c.bf16 %v773_v55, %v770_v54  ;;  %v804_v54 = vld [vmem:[#allocation14 + $0x148] sm:$0xff] }
 0x19c   : > { %1482 = vmatprep.subr.bf16.mxu1 %v1890_v47  ;;  %v1493_v58 = vpack.c.bf16 %v766_v50, %v763_v46  ;;  %v806_v55 = vld [vmem:[#allocation14 + $0x158] sm:$0xff] }
 0x19e   : > { %1462 = vmatpush1.bf16.msra.mxu0 %v1461_v4  ;;  %v776_v4 = vld [vmem:[#allocation14 + $0x68] sm:$0xff] }
 0x19f   : > { %1484 = vmatpush3.bf16.msra.mxu1 %v1483_v61  ;;  %1464 = vmatprep.subr.bf16.mxu0 %v1463_v9  ;;  %v1499_v9 = vpack.c.bf16 %v779_v5, %v776_v4 }
 0x1a0   : > { %1485 = vmatprep.subr.bf16.mxu1 %v1890_v47 }
 0x1a2   : > { %1466 = vmatpush1.bf16.msra.mxu0 %v1465_v16 }
 0x1a3   : > { %1487 = vmatpush3.bf16.msra.mxu1 %v1486_v8  ;;  %1492 = vmatprep.subr.bf16.mxu0 %v1491_v18  ;;  %v1527_v8 = vpack.c.bf16 %v774_v3, %v771_v2  ;;  %v784_v18 = vld [vmem:[#allocation14 + $0xa8] sm:$0xff]  ;;  %v810_v2 = vld [vmem:[#allocation14 + $0x178] sm:$0xff] }
 0x1a4   : > { %1488 = vmatprep.subr.bf16.mxu1 %v1890_v47  ;;  %v1545_v4 = vpack.c.bf16 %v810_v2, %v807_v63 }
 0x1a7   : > { %1490 = vmatpush3.bf16.msra.mxu1 %v1489_v17  ;;  %v1503_v17 = vpack.c.bf16 %v785_v13, %v782_v12 }
 0x1a8   : > { %1523 = vmatprep.subr.bf16.mxu1 %v1890_v47 }
 0x258   : > { %v454_v20 = vpop.f32.mrb[0].mxu0 }
 0x259   : > { %v529_v24 = vadd.f32 %v454_v20, %v339_v19  ;;  %v456_v27 = vpop.f32.mrb[1].mxu0  ;;  %v783_v19 = vld [vmem:[#allocation14 + $0xa0] sm:$0xff]  ;;  %v786_v20 = vld [vmem:[#allocation14 + $0xb8] sm:$0xff] }
 0x25a   : > { %v539_v31 = vadd.f32 %v537_v23, %v456_v27  ;;  %v788_v23 = vld [vmem:[#allocation14 + $0xc8] sm:$0xff]  ;;  %v1505_v27 = vpack.c.bf16 %v784_v18, %v781_v15 }
 0x25b   : > { %v1136_v30 = vmul.f32 -1.442695, %v529_v24  ;;  %v791_v24 = vld [vmem:[#allocation14 + $0xe0] sm:$0xff] }
 0x25c   : > { %v1137_v32 = vmul.f32 -1.442695, %v539_v31  ;;  %v1533_v31 = vpack.c.bf16 %v786_v20, %v783_v19  ;;  %v966_v19 = vld [vmem:[%s2212_s9] sm:$0x1]  ;;  %v618_v20 = vrot.slane %v605_v7, %v167_v28  ;;  %s1893_s9 = smov (%p325_p0), [#allocation18]  }
 0x25d   : > { %1618 = vpow2.f32 %v1136_v30  ;;  %v525_v33 = vpop.f32.mrb[0].mxu1  ;;  %v787_v30 = vld [vmem:[#allocation14 + $0xc0] sm:$0xff]  ;;  %s1102_s16 = sshll.u32 (%p325_p0), %s1893_s9, 4  ;;  %s1103_s16 = int_to_ptr.vmem [resolvable:$true] %s1102_s16 }
 0x25e   : > { %v1259_v34 = vpop.f32.mrb[1].mxu1  ;;  %1620 = vpow2.f32 %v1137_v32  ;;  %v547_v40 = vadd.f32 %v546_v38, %v525_v33  ;;  %v790_v32 = vld [vmem:[#allocation14 + $0xd8] sm:$0xff]  ;;  %v789_v33 = vld [vmem:[#allocation14 + $0xd0] sm:$0xff]  ;;  %s1796_s17 = scalar_lea.vmem (%p325_p0), %s1103_s16, 32  ;;  %p1801_p2 = scmp.lt.s32.totalorder (%p325_p0), %s1103_s16, %s1103_s16 }
 0x25f   : > { %v792_v34 = vld [vmem:[#allocation14 + $0xe8] sm:$0xff]  ;;  %v793_v38 = vld [vmem:[#allocation14 + $0xf0] sm:$0xff]  ;;  %p1797_p1 = scmp.ne.s32.totalorder (%p325_p0), %s1103_s16, %s1796_s17  ;;  %p1802_p3 = scmp.lt.s32.totalorder (%p325_p0), %s1796_s17, %s1796_s17 }
 0x261   :  { %p1803_p4 = por (%p325_p0), %p1802_p3, %p1801_p2 }
 0x263   :  { %p1804_p5 = pnand (%p325_p0), %p1803_p4, %p1797_p1 }
 0x267   : > { %v1619_v35 = vpop.eup %1618 }
 0x268   : > { %v533_v36 = vadd.f32 1.0, %v1619_v35  ;;  %v1621_v37 = vpop.eup %1620  ;;  %v794_v35 = vld [vmem:[#allocation14 + $0xf8] sm:$0xff] }
 0x269   : > { %v543_v39 = vadd.f32 1.0, %v1621_v37  ;;  %v1509_v37 = vpack.c.bf16 %v790_v32, %v787_v30 }
 0x26a   : > { %1622 = vrcp.f32 %v533_v36  ;;  %v797_v36 = vld [vmem:[#allocation14 + $0x110] sm:$0xff] }
 0x26b   : > { %1624 = vrcp.f32 %v543_v39  ;;  %v1536_v39 = vpack.c.bf16 %v792_v34, %v789_v33 }
 0x274   : > { %v1623_v42 = vpop.eup %1622 }
 0x275   : > { %v548_v43 = vmul.f32 %v1623_v42, %v547_v40  ;;  %v1625_v45 = vpop.eup %1624  ;;  %v1511_v40 = vpack.c.bf16 %v797_v36, %v794_v35  ;;  %v795_v42 = vld [vmem:[#allocation14 + $0x100] sm:$0xff] }
 0x276   : > { %v553_v49 = vsub.f32 1.0, %v1625_v45  ;;  %v555_v57 = vmul.f32 %v1870_v21, %v1625_v45  ;;  %v803_v45 = vld [vmem:[#allocation14 + $0x140] sm:$0xff] }
 0x277   : > { %v551_v44 = vadd.f32 %v549_v41, %v548_v43  ;;  %v796_v41 = vld [vmem:[#allocation14 + $0x108] sm:$0xff]  ;;  %v798_v43 = vld [vmem:[#allocation14 + $0x118] sm:$0xff] }
 0x278   : > { %v1513_v46 = vpack.c.bf16 %v796_v41, %v793_v38  ;;  %v1539_v50 = vpack.c.bf16 %v798_v43, %v795_v42  ;;  %v982_v38 = vld [vmem:[#allocation16] sm:$0xff] (%p325_p0)  ;;  %v985_v42 = vld [vmem:[#allocation16 + $0x18] sm:$0xff] (%p325_p0) }
 0x279   : > { %1626 = vtanh.f32 %v551_v44  ;;  %v800_v44 = vld [vmem:[#allocation14 + $0x128] sm:$0xff] }
 0x27a   : > { %v1515_v51 = vpack.c.bf16 %v803_v45, %v800_v44  ;;  %v986_v44 = vld [vmem:[#allocation16 + $0x20] sm:$0xff] (%p325_p0)  ;;  %v987_v45 = vld [vmem:[#allocation16 + $0x28] sm:$0xff] (%p325_p0) }
 0x283   : > { %v1627_v53 = vpop.eup %1626 }
 0x284   : > { %v554_v56 = vmul.f32 %v1627_v53, %v553_v49  ;;  %v799_v49 = vld [vmem:[#allocation14 + $0x120] sm:$0xff]  ;;  %v801_v53 = vld [vmem:[#allocation14 + $0x130] sm:$0xff] }
 0x285   : > { %v1542_v59 = vpack.c.bf16 %v804_v54, %v801_v53  ;;  %v996_v54 = vld [vmem:[#allocation16 + $0x70] sm:$0xff] (%p325_p0) }
 0x286   : > { %v2127_v21 = vadd.f32 %v555_v57, %v554_v56   ;;  %v809_v56 = vld [vmem:[#allocation14 + $0x170] sm:$0xff]  ;;  %v1517_v57 = vpack.c.bf16 %v802_v52, %v799_v49  ;;  %v993_v49 = vld [vmem:[#allocation16 + $0x58] sm:$0xff] (%p325_p0)  ;;  %v995_v52 = vld [vmem:[#allocation16 + $0x68] sm:$0xff] (%p325_p0) }
 0x288   : > { %v2217_v61 = vmov %v2127_v21  ;;  %v777_v21 = vld [vmem:[#allocation14 + $0x70] sm:$0xff] }
 0x289   : > { %687 = vmatmul.mubr.f32.vlgmr.msra.gmra.mrb[2].mxu0 %v2217_v61  ;;  %1293 = vmatmul.mubr.f32.vlgmr.msra.gmra.mrb[2].mxu1 %v2217_v61  ;;  %v1530_v16 = vpack.c.bf16 %v780_v11, %v777_v21  ;;  %977 = vst [vmem:[#allocation4] sm:$0x1] (%p325_p0), %v2217_v61 }
 0x28a   : > { %1494 = vmatpush1.bf16.msra.mxu0 %v1493_v58  ;;  %1525 = vmatpush3.bf16.msra.mxu1 %v1524_v60  ;;  %v805_v58 = vld [vmem:[#allocation14 + $0x150] sm:$0xff]  ;;  %v1519_v60 = vpack.c.bf16 %v809_v56, %v806_v55  ;;  %v997_v55 = vld [vmem:[#allocation16 + $0x78] sm:$0xff] (%p325_p0) }
 0x28b   : > { %1496 = vmatprep.subr.bf16.mxu0 %v1495_v62  ;;  %1526 = vmatprep.subr.bf16.mxu1 %v1890_v47  ;;  %v808_v62 = vld [vmem:[#allocation14 + $0x168] sm:$0xff]  ;;  %v1569_v56 = vpack.c.bf16 (%p325_p0), %v997_v55, %v996_v54 }
 0x28c   : > { %875 = vmatprep.mubr.f32.mxu0 %v1891_v48  ;;  %1327 = vmatprep.mubr.msk.f32.mxu1 %vm1892_vm2, %v1891_v48  ;;  %v1507_v48 = vpack.c.bf16 %v791_v24, %v788_v23  ;;  %v1521_v3 = vpack.c.bf16 %v808_v62, %v805_v58  ;;  %v1140_v58 = vld [vmem:[%s2214_s11] ss:$0 sm:$0xff] (%p325_p0) }
 0x28e   : > { %1498 = vmatpush1.bf16.msra.mxu0 %v1497_v6  ;;  %1528 = vmatpush3.bf16.msra.mxu1 %v1527_v8  ;;  %v610_v8 = vrot.slane %v605_v7, %v159_v26  ;;  %v989_v26 = vld [vmem:[#allocation16 + $0x38] sm:$0xff] (%p325_p0) }
 0x28f   : > { %1500 = vmatprep.subr.bf16.mxu0 %v1499_v9  ;;  %1529 = vmatprep.subr.bf16.mxu1 %v1890_v47  ;;  %v1557_v28 = vpack.c.bf16 (%p325_p0), %v989_v26, %v988_v25 }
 0x292   : > { %1502 = vmatpush1.bf16.msra.mxu0 %v1501_v14  ;;  %1531 = vmatpush3.bf16.msra.mxu1 %v1530_v16 }
 0x293   : > { %1504 = vmatprep.subr.bf16.mxu0 %v1503_v17  ;;  %1532 = vmatprep.subr.bf16.mxu1 %v1890_v47 }
 0x296   : > { %1506 = vmatpush1.bf16.msra.mxu0 %v1505_v27  ;;  %1534 = vmatpush3.bf16.msra.mxu1 %v1533_v31 }
 0x297   : > { %1508 = vmatprep.subr.bf16.mxu0 %v1507_v48  ;;  %1535 = vmatprep.subr.bf16.mxu1 %v1890_v47 }
 0x29a   : > { %1510 = vmatpush1.bf16.msra.mxu0 %v1509_v37  ;;  %1537 = vmatpush3.bf16.msra.mxu1 %v1536_v39  ;;  %v983_v39 = vld [vmem:[#allocation16 + $0x8] sm:$0xff] (%p325_p0) }
 0x29b   : > { %1512 = vmatprep.subr.bf16.mxu0 %v1511_v40  ;;  %1538 = vmatprep.subr.bf16.mxu1 %v1890_v47  ;;  %v984_v40 = vld [vmem:[#allocation16 + $0x10] sm:$0xff] (%p325_p0)  ;;  %v1548_v41 = vpack.c.bf16 (%p325_p0), %v983_v39, %v982_v38 }
 0x29c   :  { %v1551_v43 = vpack.c.bf16 (%p325_p0), %v985_v42, %v984_v40 }
 0x29e   : > { %1514 = vmatpush1.bf16.msra.mxu0 %v1513_v46  ;;  %1540 = vmatpush3.bf16.msra.mxu1 %v1539_v50  ;;  %v992_v46 = vld [vmem:[#allocation16 + $0x50] sm:$0xff] (%p325_p0) }
 0x29f   : > { %1516 = vmatprep.subr.bf16.mxu0 %v1515_v51  ;;  %1541 = vmatprep.subr.bf16.mxu1 %v1890_v47  ;;  %v1563_v50 = vpack.c.bf16 (%p325_p0), %v993_v49, %v992_v46  ;;  %v994_v51 = vld [vmem:[#allocation16 + $0x60] sm:$0xff] (%p325_p0) }
 0x2a0   :  { %v1566_v53 = vpack.c.bf16 (%p325_p0), %v995_v52, %v994_v51 }
 0x2a2   : > { %1518 = vmatpush1.bf16.msra.mxu0 %v1517_v57  ;;  %1543 = vmatpush3.bf16.msra.mxu1 %v1542_v59 }
 0x2a3   : > { %1520 = vmatprep.subr.bf16.mxu0 %v1519_v60  ;;  %1544 = vmatprep.subr.bf16.mxu1 %v1890_v47 }
 0x2a6   : > { %1522 = vmatpush1.bf16.msra.mxu0 %v1521_v3  ;;  %1546 = vmatpush3.bf16.msra.mxu1 %v1545_v4 }
 0x2a7   :  { %1547 = vmatprep.subr.bf16.mxu0 (%p325_p0), %v1887_v0 }
 0x2a9   : > { %876 = vmatmul.mubr.f32.vlgmr.msra.gmra.mrb[2].mxu0 %v1866_v22  ;;  %1328 = vmatmul.mubr.f32.vlgmr.msra.gmra.mrb[4].mxu1 %v1866_v22 }
 0x2aa   :  { %1362 = vmatprep.mubr.msk.f32.mxu0 (%p325_p0), %vm1889_vm0, %v1888_v1  ;;  %1549 = vmatpush3.bf16.msra.mxu0 (%p325_p0), %v1548_v41  ;;  %v990_v1 = vld [vmem:[#allocation16 + $0x40] sm:$0xff] (%p325_p0) }
 0x2ab   :  { %1550 = vmatprep.subr.bf16.mxu0 (%p325_p0), %v1887_v0 }
 0x2ae   :  { %1552 = vmatpush3.bf16.msra.mxu0 (%p325_p0), %v1551_v43 }
 0x2af   :  { %1553 = vmatprep.subr.bf16.mxu0 (%p325_p0), %v1887_v0 }
 0x35c   : > { %v759_v5 = vpop.f32.mrb[2].mxu1 }
 0x35d   : > { %v1294_v6 = vpop.f32.mrb[3].mxu1  ;;  %v760_v30 = vadd.f32 %v759_v5, %v618_v20 }
 0x37c   : > { %v877_v9 = vpop.f32.mrb[2].mxu0  ;;  %v948_v47 = vpop.f32.mrb[4].mxu1 }
 0x37d   : > { %v1571_v21 = vadd.f32 %v877_v9, %v610_v8  ;;  %v879_v11 = vpop.f32.mrb[3].mxu0  ;;  %v1329_v12 = vpop.f32.mrb[5].mxu1  ;;  %v967_v24 = vadd.f32 %v966_v19, %v948_v47 }
 0x37e   : > { %v1572_v14 = vadd.f32 %v879_v11, %v614_v10 }
 0x37f   : > { %v1138_v13 = vmul.f32 -1.442695, %v1571_v21  ;;  %v2219_v21 = vmov %v2217_v61  ;;  %v1560_v61 = vpack.c.bf16 (%p325_p0), %v991_v29, %v990_v1 }
 0x380   : > { %v1139_v15 = vmul.f32 -1.442695, %v1572_v14 }
 0x381   : > { %1628 = vpow2.f32 %v1138_v13 }
 0x382   : > { %1630 = vpow2.f32 %v1139_v15 }
 0x38b   : > { %v1629_v16 = vpop.eup %1628 }
 0x38c   : > { %v956_v17 = vadd.f32 1.0, %v1629_v16  ;;  %v1631_v18 = vpop.eup %1630 }
 0x38d   : > { %v963_v23 = vadd.f32 1.0, %v1631_v18 }
 0x38e   : > { %1632 = vrcp.f32 %v956_v17 }
 0x38f   : > { %1634 = vrcp.f32 %v963_v23 }
 0x398   : > { %v1633_v27 = vpop.eup %1632 }
 0x399   : > { %v968_v31 = vmul.f32 %v1633_v27, %v967_v24  ;;  %v1635_v32 = vpop.eup %1634 }
 0x39a   : > { %v971_v33 = vsub.f32 1.0, %v1635_v32  ;;  %v973_v35 = vmul.f32 %v1866_v22, %v1635_v32 }
 0x39b   : > { %v969_v48 = vadd.f32 %v968_v31, %v760_v30 }
 0x39d   : > { %1636 = vtanh.f32 %v969_v48 }
 0x3a6   :  { %327 = sbr.rel (!%p325_p0) target bundleno = 354 (0x162), region = 117 }
 0x3a7   : > { %v1637_v34 = vpop.eup %1636 }
 0x3a8   : > { %v972_v36 = vmul.f32 %v1637_v34, %v971_v33 }
 0x3aa   : > { %v974_v37 = vadd.f32 %v973_v35, %v972_v36  }
 0x3ac   : > { %976 = vst [vmem:[%s975_s14] sm:$0x1] %v974_v37  ;;  %v2218_v22 = vmov %v974_v37  ;;  %978 = vst [vmem:[#allocation4 + $0x1] sm:$0x1] (%p325_p0), %v974_v37 }
 0x3ad   :  { %v1554_v22 = vpack.c.bf16 %v987_v45, %v986_v44 }
 0x3af   :  { %1555 = vmatpush3.bf16.msra.mxu0 %v1554_v22 }
 0x3b0   :  { %1556 = vmatprep.subr.bf16.mxu0 %v1887_v0 }
 0x3b3   :  { %1558 = vmatpush3.bf16.msra.mxu0 %v1557_v28  ;;  %v981_v57 = vld [vmem:[#allocation3] sm:$0xff]  ;;  %v979_v5 = vld [vmem:[#allocation4] sm:$0x3] }
 0x3b4   :  { %1559 = vmatprep.subr.bf16.mxu0 %v1887_v0  ;;  %980 = vst [vmem:[#allocation18] sm:$0x3] %v979_v5 }
 0x3b7   :  { %1561 = vmatpush3.bf16.msra.mxu0 %v1560_v61 }
 0x3b8   :  { %1562 = vmatprep.subr.bf16.mxu0 %v1887_v0 }
 0x3bb   :  { %1564 = vmatpush3.bf16.msra.mxu0 %v1563_v50 }
 0x3bc   :  { %1565 = vmatprep.subr.bf16.mxu0 %v1887_v0 }
 0x3bf   :  { %1567 = vmatpush3.bf16.msra.mxu0 %v1566_v53 }
 0x3c0   :  { %1568 = vmatprep.subr.bf16.mxu0 %v1887_v0 }
 0x3c3   :  { %1570 = vmatpush3.bf16.msra.mxu0 %v1569_v56 }
 0x3c6   :  { %1363 = vmatmul.mubr.f32.vlgmr.msra.gmra.mrb[0].mxu0 %v981_v57 }
 0x499   :  { %v1071_v59 = vpop.f32.mrb[0].mxu0 }
 0x49a   :  { %v1072_v60 = vadd.f32 %v1140_v58, %v1071_v59  ;;  %v1364_v62 = vpop.f32.mrb[1].mxu0 }
 0x49c   :  { %1075 = vmax.xlane.f32.xlu0 %v1072_v60 }
 0x529   :  { %v1076_v63 = vpop.xlane.xlu0 %1075 }
 0x52a   :  { %v1077_v2 = vsub.f32 %v1072_v60, %v1076_v63 }
 0x52c   :  { %v1078_v3 = vmul.f32 1.442695, %v1077_v2 }
 0x52e   :  { %1638 = vpow2.f32 %v1078_v3 }
 0x538   :  { %v1639_v4 = vpop.eup %1638 }
 0x539   :  { %1080 = vadd.xlane.f32.xlu0 %v1639_v4 }
 0x53a   :  { %1807 = shalt.err (!%p1804_p5)
}
 0x53b   :  { %s1808_s30 = scalar_lea.hbm %s2216_s13, 32 }
 0x53c   :  { %p1809_p6 = scmp.ne.s32.totalorder %s2216_s13, %s1808_s30  ;;  %p1812_p7 = scmp.lt.u32.totalorder %s1808_s30, %s2216_s13 }
 0x53e   :  { %p1814_p8 = pnand %p1812_p7, %p1809_p6 }
 0x540   :  { %1817 = shalt.err (!%p1814_p8)
}
 0x541   :  { %1105 = dma.vmem_to_hbm [thread:$0]  %s1103_s16, 32, %s2216_s13, [#allocation19]  }
 0x542   :  { %s1894_s10 = smov [#allocation17]  }
 0x543   :  { %s1092_s22 = sshll.u32 %s1894_s10, 4  ;;  %s1093_s22 = int_to_ptr.vmem [resolvable:$true] %s1092_s22 }
 0x544   :  { %s1818_s4 = scalar_lea.vmem %s1093_s22, 128  ;;  %p1823_p10 = scmp.lt.s32.totalorder %s1093_s22, %s1093_s22 }
 0x545   :  { %p1819_p9 = scmp.ne.s32.totalorder %s1093_s22, %s1818_s4  ;;  %p1824_p11 = scmp.lt.s32.totalorder %s1818_s4, %s1818_s4 }
 0x547   :  { %p1825_p12 = por %p1824_p11, %p1823_p10 }
 0x549   :  { %p1826_p13 = pnand %p1825_p12, %p1819_p9 }
 0x5c6   :  { %v1081_v0 = vpop.xlane.xlu0 %1080 }
 0x5c7   :  { %1640 = vlog2.f32 %v1081_v0 }
 0x5d1   :  { %v1641_v6 = vpop.eup %1640 }
 0x5d2   :  { %v1083_v7 = vmul.f32 0.6931472, %v1641_v6 }
 0x5d4   :  { %v1084_v8 = vsub.f32 %v1077_v2, %v1083_v7 }
 0x5d6   :  { %1085 = vst [vmem:[#allocation17] sm:$0xff] %v1084_v8 }
 0x5d7   :  { %1829 = shalt.err (!%p1826_p13)
}
 0x5d8   :  { %s1830_s13 = scalar_lea.hbm %s2215_s12, 128 }
 0x5d9   :  { %p1831_p0 = scmp.ne.s32.totalorder %s2215_s12, %s1830_s13  ;;  %p1834_p1 = scmp.lt.u32.totalorder %s1830_s13, %s2215_s12 }
 0x5db   :  { %p1836_p2 = pnand %p1834_p1, %p1831_p0 }
 0x5dd   :  { %1839 = shalt.err (!%p1836_p2)
}
 0x5de   :  { %1095 = dma.vmem_to_hbm [thread:$0]  %s1093_s22, 128, %s2215_s12, [#allocation7]  }
 0x5df   :  { %1860 = dma.done.wait [#allocation7], 128  }
 0x5e0   :  { %1861 = vsyncadd [#allocation7], 4294967168 }
 0x5e1   :  { %1862 = dma.done.wait [#allocation19], 32  }
 0x5e2   :  { %1863 = vsyncadd [#allocation19], 4294967264 }
 0x5e3   :  { %1112 = vsyncpa [#allocation6], 1 }
 0x5e4   :  { %1113 = vsyncpa [#allocation9], 1 }
 0x5e5   :  { %1114 = vsyncpa [#allocation12], 1 }
 0x5e6   :  { %1115 = vsyncpa [#allocation15], 1 }
 0x5e7   :  { %1116 = vsyncpa [#allocation7], 1 }
 0x5e8   :  { %1117 = vsyncpa [#allocation19], 1 }

</bundles_post_ra>
